<compile_context>
chip_gen: v7x
topology: tpu7x:2x2x1
jax: 0.10.0
libtpu: 0.0.40
codegen_flags: <defaults>
</compile_context>

<pallas_src>
import functools

import jax
import jax.numpy as jnp
from jax.experimental import pallas as pl
from jax.experimental.pallas import tpu as pltpu


def jumper_kernel(embs_ref, q_ref, len_ref, lab_ref, gum_ref, drop_ref,
                  wx_ref, bcat_ref, wstep_ref, bhead_ref,
                  ws1_ref, bs1_ref, ws2_ref, bs2_ref,
                  loss_ref, *, B, H, S1, Kp1, N, max_seq):
    f32 = jnp.float32
    bf16 = jnp.bfloat16
    H4 = 4 * H

    embs_flat = embs_ref[...]       # (BSP, H) f32, row b*S1+r (zero padded)
    BSP = embs_flat.shape[0]
    q_emb = q_ref[...]              # (B, H) f32
    lengths = len_ref[...]          # (B, 1) int32 (question already counted)
    labels = lab_ref[...]           # (B, 1) f32 in {0,1}
    gum_all = gum_ref[...]          # (N*B, Kp1) pre-sampled Gumbel(0,1)
    drop_keep = drop_ref[...]       # (B, 256) dropout keep-mask, scaled 1/0.9

    w_x = wx_ref[...]               # (H, 4H) bf16 input->gates, order (i,f,o,g)
    b_cat = bcat_ref[...]           # (1, 4H) f32 fused b_ih + b_hh
    w_step = wstep_ref[...]         # (H, 4H+Kp1+1) bf16 [hh-gates|logits|baseline]
    b_head = bhead_ref[...]         # (1, Kp1+1) f32
    ws1 = ws1_ref[...]              # (3H, 256) bf16 score-net L1, (Q-P) folded
    bs1 = bs1_ref[...]              # (1, 256) f32
    ws2 = ws2_ref[...]              # (256, 1) bf16
    bs2 = bs2_ref[...]              # (1, 1) f32

    # ---- loop-invariant precompute (runs once, off the recurrence) ----------
    # Project every candidate embedding through the input->gates weight on the
    # MXU; the per-step "gather" then becomes a tiny one-hot matmul.
    embs_proj = jnp.dot(embs_flat.astype(bf16), w_x,
                        preferred_element_type=f32) + b_cat      # (BSP, 4H)
    embs_proj = embs_proj.astype(bf16)

    lane_iota = jax.lax.broadcasted_iota(jnp.int32, (B, BSP), 1)
    row_base = jax.lax.broadcasted_iota(jnp.int32, (B, 1), 0) * S1
    kidx = jax.lax.broadcasted_iota(jnp.int32, (B, Kp1), 1)

    # Q-side contribution of the score net is also loop-invariant.
    q_hid = jnp.dot(q_emb.astype(bf16), ws1[0:H, :],
                    preferred_element_type=f32)                  # (B, 256)

    # ---- recurrent state ----------------------------------------------------
    h = jnp.zeros((B, H), f32)
    c = jnp.zeros((B, H), f32)
    gates_h = jnp.zeros((B, H4), f32)   # h @ W_hh carried from previous step
    P = jnp.zeros((B, H), f32)          # captured hidden per batch element
    captured = jnp.zeros((B, 1), f32)
    rows = jnp.zeros((B, 1), jnp.int32)
    run = jnp.ones((1, 1), f32)         # 1 until the early break fires
    tcnt = jnp.zeros((1, 1), f32)       # executed step count T
    sum_lp = jnp.zeros((B, 1), f32)
    sum_bl = jnp.zeros((B, 1), f32)
    sum_bllp = jnp.zeros((B, 1), f32)
    sum_bl2 = jnp.zeros((B, 1), f32)
    cnt_v = jnp.zeros((B, 1), f32)

    for n in range(N):                  # static unroll, N is small
        fp = rows >= lengths            # feed_previous (B,1)
        fp_f = fp.astype(f32)
        rows_c = jnp.where(fp, lengths - 1, rows)

        # capture previous h for rows that just ran off the end
        newly = run * fp_f * (1.0 - captured)
        P = P + newly * (h - P)
        captured = captured + newly

        # embedding gather + input->gates projection as one one-hot matmul
        onehot = (lane_iota == (rows_c + row_base)).astype(bf16)  # (B, BSP)
        gates_x = jnp.dot(onehot, embs_proj, preferred_element_type=f32)
        gates = gates_x + gates_h        # b_cat already folded into embs_proj

        sig = jax.nn.sigmoid(gates[:, 0:3 * H])
        i_g = sig[:, 0:H]
        f_g = sig[:, H:2 * H]
        o_g = sig[:, 2 * H:3 * H]
        g_g = jnp.tanh(gates[:, 3 * H:H4])
        c_new = f_g * c + i_g * g_g
        h_new = o_g * jnp.tanh(c_new)

        # one fused matmul: next step's hh-gates ++ jump logits ++ baseline
        out = jnp.dot(h_new.astype(bf16), w_step, preferred_element_type=f32)
        gates_h_new = out[:, 0:H4]
        lb = out[:, H4:H4 + Kp1 + 1] + b_head
        logits = lb[:, 0:Kp1]
        baseline = lb[:, Kp1:Kp1 + 1]

        # Gumbel-max sample straight from the raw logits (argmax is invariant
        # to the softmax shift) -> log-softmax stays off the rows chain.
        pert = logits + gum_all[n * B:(n + 1) * B, :]
        is_max = pert >= jnp.max(pert, axis=1, keepdims=True)
        jump = jnp.min(jnp.where(is_max, kidx, Kp1), axis=1, keepdims=True)
        rows_new = rows_c + 1 + jump

        # log-prob of the sampled jump (feeds only the accumulators)
        mx = jnp.max(logits, axis=1, keepdims=True)
        lse = mx + jnp.log(jnp.sum(jnp.exp(logits - mx), axis=1, keepdims=True))
        logit_j = jnp.sum(jnp.where(kidx == jump, logits, 0.0),
                          axis=1, keepdims=True)
        log_prob = logit_j - lse

        # masked accumulation (zero where feed_previous or after the break)
        w = run * (1.0 - fp_f)
        sum_lp = sum_lp + w * log_prob
        sum_bl = sum_bl + w * baseline
        sum_bllp = sum_bllp + w * (baseline * log_prob)
        sum_bl2 = sum_bl2 + w * (baseline * baseline)
        cnt_v = cnt_v + w
        tcnt = tcnt + run               # reward_a += 1 while still running

        # state update, gated by the sticky "loop not yet broken" flag
        h = h + run * (h_new - h)
        c = c + run * (c_new - c)
        gates_h = gates_h + run * (gates_h_new - gates_h)
        rows = rows + run.astype(jnp.int32) * (rows_new - rows)
        alldone = jnp.min((rows_new >= lengths).astype(f32),
                          axis=0, keepdims=True)                  # (1,1)
        run = run * (1.0 - alldone)

    # rows never captured by feed_previous use the final hidden state
    P_final = jnp.where(captured > 0.5, P, h)

    # score_net([Q, P, Q-P, Q*P]):  hid = Q@(A+C) + P@(B-C) + (Q*P)@D + b
    p_bf = P_final.astype(bf16)
    qp_bf = (q_emb * P_final).astype(bf16)
    hid = (q_hid
           + jnp.dot(p_bf, ws1[H:2 * H, :], preferred_element_type=f32)
           + jnp.dot(qp_bf, ws1[2 * H:3 * H, :], preferred_element_type=f32)
           + bs1)
    hid = hid * drop_keep                                        # Dropout(0.1)
    hid = jnp.where(hid >= 0.0, hid, 0.01 * hid)                 # LeakyReLU
    s2 = jnp.dot(hid.astype(bf16), ws2, preferred_element_type=f32) + bs2
    scores = jax.nn.sigmoid(s2)                                  # (B, 1)

    pred = (scores > 0.5).astype(f32)
    reward_r = (pred == labels).astype(f32)                      # (B, 1)
    reward_a = -tcnt / float(max_seq)                            # (1, 1)
    R = reward_a + reward_r                                      # (B, 1)
    denom = float(B) * tcnt                                      # (1, 1) = B*T

    # reinforce_loss = mean((rewards - baselines) * log_probs)
    reinf = jnp.sum(R * sum_lp - sum_bllp, axis=0, keepdims=True) / denom
    # mse_loss = mean((baselines - rewards)^2)
    mse = jnp.sum(sum_bl2 - 2.0 * R * sum_bl + R * R * cnt_v,
                  axis=0, keepdims=True) / denom
    # focal loss (alpha=1, gamma=2, logits=False, reduce=True -> sum over B)
    eps = 1e-7
    s_c = jnp.clip(scores, eps, 1.0 - eps)
    pt = jnp.where(labels > 0.5, s_c, 1.0 - s_c)
    bce = -jnp.log(pt)
    focal = jnp.sum((1.0 - pt) ** 2 * bce, axis=0, keepdims=True)

    loss_ref[...] = focal - reinf + mse


def jumper_forward(embs_flat, q_emb, lengths, labels, gumbel, drop_keep, params,
                   *, B, H, S1, Kp1, N, max_seq):
    kernel = functools.partial(jumper_kernel, B=B, H=H, S1=S1, Kp1=Kp1,
                               N=N, max_seq=max_seq)
    n_in = 6 + len(params)
    # Everything (<0.5 MiB) stays whole-array VMEM-resident; no grid/tiling.
    # For multi-instance throughput on v7x one would add a leading "parallel"
    # grid axis over stacked instances; a single instance needs only one TC.
    in_specs = [pl.BlockSpec(memory_space=pltpu.MemorySpace.VMEM)
                for _ in range(n_in)]
    return pl.pallas_call(
        kernel,
        out_shape=jax.ShapeDtypeStruct((1, 1), jnp.float32),
        in_specs=in_specs,
        out_specs=pl.BlockSpec(memory_space=pltpu.MemorySpace.VMEM),
    )(embs_flat, q_emb, lengths, labels, gumbel, drop_keep, *params)


if __name__ == "__main__":
    # args: hidden_size=32, K=3, N=5, max_seq=8, batch=8, vocab=64
    B, H, S, K, N, V = 8, 32, 8, 3, 5, 64
    S1, Kp1 = S + 1, K + 1

    key = jax.random.PRNGKey(0)
    ks = jax.random.split(key, 24)

    emb_table = jax.random.normal(ks[0], (V, H), jnp.float32) * 0.5
    questions = jax.random.randint(ks[1], (B,), 0, V)
    contexts = jax.random.randint(ks[2], (B, S), 0, V)
    lens0 = jax.random.randint(ks[3], (B,), 2, S + 1)           # valid tokens
    masks = (jnp.arange(S)[None, :] >= lens0[:, None]).astype(jnp.int32)
    labels = jax.random.randint(ks[4], (B,), 0, 2).astype(jnp.float32)

    # host-side glue: embedding gathers (same as the torch copy_ loops)
    lengths = ((masks == 0).sum(axis=1) + 1).astype(jnp.int32).reshape(B, 1)
    Q_emb = emb_table[questions]                                 # (B, H)
    A_emb = jnp.where((masks == 0)[:, :, None], emb_table[contexts], 0.0)
    input_embs = jnp.concatenate([Q_emb[:, None, :], A_emb], axis=1)  # (B,S1,H)

    # flatten to (B*S1, H) rows (index b*S1+r) and pad rows to a lane-friendly
    # multiple of 128 for the in-kernel one-hot gather matmul
    BSP = max(128, ((B * S1 + 127) // 128) * 128)
    embs_flat = jnp.zeros((BSP, H), jnp.float32).at[:B * S1].set(
        input_embs.reshape(B * S1, H))

    def init(k, shape, scale=0.1):
        return jax.random.normal(k, shape, jnp.float32) * scale

    w_ih = init(ks[5], (4 * H, H));  b_ih = init(ks[6], (4 * H,))
    w_hh = init(ks[7], (4 * H, H));  b_hh = init(ks[8], (4 * H,))
    w_lin = init(ks[9], (Kp1, H));   b_lin = init(ks[10], (Kp1,))
    w_base = init(ks[11], (1, H));   b_base = init(ks[12], (1,))
    w_s1 = init(ks[13], (256, 4 * H)); b_s1 = init(ks[14], (256,))
    w_s2 = init(ks[15], (1, 256));   b_s2 = init(ks[16], (1,))

    # reorder LSTM gates (i,f,g,o) -> (i,f,o,g): one sigmoid over [0:3H], one tanh
    perm = jnp.concatenate([jnp.arange(0, 2 * H),
                            jnp.arange(3 * H, 4 * H),
                            jnp.arange(2 * H, 3 * H)])
    w_x = w_ih[perm].T.astype(jnp.bfloat16)                      # (H, 4H)
    b_cat = (b_ih + b_hh)[perm].reshape(1, 4 * H)                # (1, 4H) f32
    w_head = jnp.concatenate([w_lin.T, w_base.T], axis=1)        # (H, Kp1+1)
    b_head = jnp.concatenate([b_lin, b_base]).reshape(1, Kp1 + 1)
    # fuse hh-gates + jump-logits + baseline heads into one per-step weight
    w_step = jnp.concatenate([w_hh[perm].T, w_head],
                             axis=1).astype(jnp.bfloat16)        # (H, 4H+Kp1+1)
    # fold the (Q-P) term of the score net into the first-layer weights
    ws1 = w_s1.T                                                 # (4H, 256)
    ws1_fold = jnp.concatenate([ws1[0:H] + ws1[2 * H:3 * H],
                                ws1[H:2 * H] - ws1[2 * H:3 * H],
                                ws1[3 * H:4 * H]], axis=0).astype(jnp.bfloat16)

    params = (w_x, b_cat, w_step, b_head,
              ws1_fold, b_s1.reshape(1, -1),
              w_s2.T.astype(jnp.bfloat16), b_s2.reshape(1, -1))

    # randomness generated on the host (Categorical sampling + Dropout(0.1));
    # torch RNG streams cannot be bit-matched anyway.
    u = jax.random.uniform(ks[17], (N * B, Kp1), jnp.float32,
                           minval=1e-6, maxval=1.0 - 1e-6)
    gumbel = -jnp.log(-jnp.log(u))
    drop_keep = ((jax.random.uniform(ks[18], (B, 256), jnp.float32) >= 0.1)
                 .astype(jnp.float32) / 0.9)

    loss = jumper_forward(embs_flat, Q_emb, lengths, labels.reshape(B, 1),
                          gumbel, drop_keep, params,
                          B=B, H=H, S1=S1, Kp1=Kp1, N=N, max_seq=S)
    loss = jax.block_until_ready(loss)
    assert loss.shape == (1, 1) and bool(jnp.isfinite(loss[0, 0]))
    print("KERNEL_OK")
</pallas_src>

<mosaic_0001>
module attributes {stable_mosaic.version = 11 : i64} {
  func.func @jumper_kernel(%arg0: memref<128x32xf32, #tpu.memory_space<vmem>>, %arg1: memref<8x32xf32, #tpu.memory_space<vmem>>, %arg2: memref<8x1xi32, #tpu.memory_space<vmem>>, %arg3: memref<8x1xf32, #tpu.memory_space<vmem>>, %arg4: memref<40x4xf32, #tpu.memory_space<vmem>>, %arg5: memref<8x256xf32, #tpu.memory_space<vmem>>, %arg6: memref<32x128xbf16, #tpu.memory_space<vmem>>, %arg7: memref<1x128xf32, #tpu.memory_space<vmem>>, %arg8: memref<32x133xbf16, #tpu.memory_space<vmem>>, %arg9: memref<1x5xf32, #tpu.memory_space<vmem>>, %arg10: memref<96x256xbf16, #tpu.memory_space<vmem>>, %arg11: memref<1x256xf32, #tpu.memory_space<vmem>>, %arg12: memref<256x1xbf16, #tpu.memory_space<vmem>>, %arg13: memref<1x1xf32, #tpu.memory_space<vmem>>, %arg14: memref<1x1xf32, #tpu.memory_space<vmem>>) attributes {dimension_semantics = [], scalar_prefetch = 0 : i64, scratch_operands = 0 : i64, tpu.core_type = #tpu.core_type<tc>} {
    %c0 = arith.constant 0 : index
    %c0_0 = arith.constant 0 : index
    %0 = vector.load %arg0[%c0, %c0_0] : memref<128x32xf32, #tpu.memory_space<vmem>>, vector<128x32xf32>
    %c0_1 = arith.constant 0 : index
    %c0_2 = arith.constant 0 : index
    %1 = vector.load %arg1[%c0_1, %c0_2] : memref<8x32xf32, #tpu.memory_space<vmem>>, vector<8x32xf32>
    %c0_3 = arith.constant 0 : index
    %c0_4 = arith.constant 0 : index
    %2 = vector.load %arg2[%c0_3, %c0_4] : memref<8x1xi32, #tpu.memory_space<vmem>>, vector<8x1xi32>
    %c0_5 = arith.constant 0 : index
    %c0_6 = arith.constant 0 : index
    %3 = vector.load %arg3[%c0_5, %c0_6] : memref<8x1xf32, #tpu.memory_space<vmem>>, vector<8x1xf32>
    %c0_7 = arith.constant 0 : index
    %c0_8 = arith.constant 0 : index
    %4 = vector.load %arg4[%c0_7, %c0_8] : memref<40x4xf32, #tpu.memory_space<vmem>>, vector<40x4xf32>
    %c0_9 = arith.constant 0 : index
    %c0_10 = arith.constant 0 : index
    %5 = vector.load %arg5[%c0_9, %c0_10] : memref<8x256xf32, #tpu.memory_space<vmem>>, vector<8x256xf32>
    %c0_11 = arith.constant 0 : index
    %c0_12 = arith.constant 0 : index
    %6 = vector.load %arg6[%c0_11, %c0_12] : memref<32x128xbf16, #tpu.memory_space<vmem>>, vector<32x128xbf16>
    %c0_13 = arith.constant 0 : index
    %c0_14 = arith.constant 0 : index
    %7 = vector.load %arg7[%c0_13, %c0_14] : memref<1x128xf32, #tpu.memory_space<vmem>>, vector<1x128xf32>
    %c0_15 = arith.constant 0 : index
    %c0_16 = arith.constant 0 : index
    %8 = vector.load %arg8[%c0_15, %c0_16] : memref<32x133xbf16, #tpu.memory_space<vmem>>, vector<32x133xbf16>
    %c0_17 = arith.constant 0 : index
    %c0_18 = arith.constant 0 : index
    %9 = vector.load %arg9[%c0_17, %c0_18] : memref<1x5xf32, #tpu.memory_space<vmem>>, vector<1x5xf32>
    %c0_19 = arith.constant 0 : index
    %c0_20 = arith.constant 0 : index
    %10 = vector.load %arg10[%c0_19, %c0_20] : memref<96x256xbf16, #tpu.memory_space<vmem>>, vector<96x256xbf16>
    %c0_21 = arith.constant 0 : index
    %c0_22 = arith.constant 0 : index
    %11 = vector.load %arg11[%c0_21, %c0_22] : memref<1x256xf32, #tpu.memory_space<vmem>>, vector<1x256xf32>
    %c0_23 = arith.constant 0 : index
    %c0_24 = arith.constant 0 : index
    %12 = vector.load %arg12[%c0_23, %c0_24] : memref<256x1xbf16, #tpu.memory_space<vmem>>, vector<256x1xbf16>
    %c0_25 = arith.constant 0 : index
    %c0_26 = arith.constant 0 : index
    %13 = vector.load %arg13[%c0_25, %c0_26] : memref<1x1xf32, #tpu.memory_space<vmem>>, vector<1x1xf32>
    %14 = arith.truncf %0 : vector<128x32xf32> to vector<128x32xbf16>
    %cst = arith.constant dense<0.000000e+00> : vector<128x128xf32>
    %15 = tpu.matmul %14, %6, %cst {dimension_numbers = #tpu.dot_dimension_numbers<[1], [0], [0], [1], [0, 0, 1, 1], [], []>} : vector<128x32xbf16>, vector<32x128xbf16>, vector<128x128xf32> -> vector<128x128xf32>
    %16 = vector.broadcast %7 : vector<1x128xf32> to vector<128x128xf32>
    %17 = arith.addf %15, %16 : vector<128x128xf32>
    %18 = arith.truncf %17 : vector<128x128xf32> to vector<128x128xbf16>
    %19 = tpu.iota {dimensions = array<i32: 1>} : vector<8x128xi32>
    %20 = tpu.iota {dimensions = array<i32: 0>} : vector<8x1xi32>
    %c9_i32 = arith.constant 9 : i32
    %21 = vector.broadcast %c9_i32 : i32 to vector<8x1xi32>
    %22 = arith.muli %20, %21 : vector<8x1xi32>
    %23 = tpu.iota {dimensions = array<i32: 1>} : vector<8x4xi32>
    %24 = arith.truncf %1 : vector<8x32xf32> to vector<8x32xbf16>
    %25 = vector.extract_strided_slice %10 {offsets = [0, 0], sizes = [32, 256], strides = [1, 1]} : vector<96x256xbf16> to vector<32x256xbf16>
    %cst_27 = arith.constant dense<0.000000e+00> : vector<8x256xf32>
    %26 = tpu.matmul %24, %25, %cst_27 {dimension_numbers = #tpu.dot_dimension_numbers<[1], [0], [0], [1], [0, 0, 1, 1], [], []>} : vector<8x32xbf16>, vector<32x256xbf16>, vector<8x256xf32> -> vector<8x256xf32>
    %cst_28 = arith.constant 0.000000e+00 : f32
    %27 = vector.broadcast %cst_28 : f32 to vector<8x32xf32>
    %cst_29 = arith.constant 0.000000e+00 : f32
    %28 = vector.broadcast %cst_29 : f32 to vector<8x32xf32>
    %cst_30 = arith.constant 0.000000e+00 : f32
    %29 = vector.broadcast %cst_30 : f32 to vector<8x128xf32>
    %cst_31 = arith.constant 0.000000e+00 : f32
    %30 = vector.broadcast %cst_31 : f32 to vector<8x32xf32>
    %cst_32 = arith.constant 0.000000e+00 : f32
    %31 = vector.broadcast %cst_32 : f32 to vector<8x1xf32>
    %c0_i32 = arith.constant 0 : i32
    %32 = vector.broadcast %c0_i32 : i32 to vector<8x1xi32>
    %cst_33 = arith.constant 1.000000e+00 : f32
    %33 = vector.broadcast %cst_33 : f32 to vector<1x1xf32>
    %cst_34 = arith.constant 0.000000e+00 : f32
    %34 = vector.broadcast %cst_34 : f32 to vector<1x1xf32>
    %cst_35 = arith.constant 0.000000e+00 : f32
    %35 = vector.broadcast %cst_35 : f32 to vector<8x1xf32>
    %cst_36 = arith.constant 0.000000e+00 : f32
    %36 = vector.broadcast %cst_36 : f32 to vector<8x1xf32>
    %cst_37 = arith.constant 0.000000e+00 : f32
    %37 = vector.broadcast %cst_37 : f32 to vector<8x1xf32>
    %cst_38 = arith.constant 0.000000e+00 : f32
    %38 = vector.broadcast %cst_38 : f32 to vector<8x1xf32>
    %cst_39 = arith.constant 0.000000e+00 : f32
    %39 = vector.broadcast %cst_39 : f32 to vector<8x1xf32>
    %40 = arith.cmpi sge, %32, %2 : vector<8x1xi32>
    %41 = arith.extui %40 : vector<8x1xi1> to vector<8x1xi32>
    %42 = arith.sitofp %41 : vector<8x1xi32> to vector<8x1xf32>
    %c1_i32 = arith.constant 1 : i32
    %43 = vector.broadcast %c1_i32 : i32 to vector<8x1xi32>
    %44 = arith.subi %2, %43 : vector<8x1xi32>
    %45 = arith.select %40, %44, %32 : vector<8x1xi1>, vector<8x1xi32>
    %46 = vector.broadcast %33 : vector<1x1xf32> to vector<8x1xf32>
    %47 = arith.mulf %46, %42 : vector<8x1xf32>
    %cst_40 = arith.constant 1.000000e+00 : f32
    %48 = vector.broadcast %cst_40 : f32 to vector<8x1xf32>
    %49 = arith.subf %48, %31 : vector<8x1xf32>
    %50 = arith.mulf %47, %49 : vector<8x1xf32>
    %51 = arith.subf %27, %30 : vector<8x32xf32>
    %52 = vector.broadcast %50 : vector<8x1xf32> to vector<8x32xf32>
    %53 = arith.mulf %52, %51 : vector<8x32xf32>
    %54 = arith.addf %30, %53 : vector<8x32xf32>
    %55 = arith.addf %31, %50 : vector<8x1xf32>
    %56 = arith.addi %45, %22 : vector<8x1xi32>
    %57 = vector.broadcast %56 : vector<8x1xi32> to vector<8x128xi32>
    %58 = arith.cmpi eq, %19, %57 : vector<8x128xi32>
    %59 = arith.extui %58 : vector<8x128xi1> to vector<8x128xi32>
    %60 = arith.sitofp %59 : vector<8x128xi32> to vector<8x128xf32>
    %61 = arith.truncf %60 : vector<8x128xf32> to vector<8x128xbf16>
    %cst_41 = arith.constant dense<0.000000e+00> : vector<8x128xf32>
    %62 = tpu.matmul %61, %18, %cst_41 {dimension_numbers = #tpu.dot_dimension_numbers<[1], [0], [0], [1], [0, 0, 1, 1], [], []>} : vector<8x128xbf16>, vector<128x128xbf16>, vector<8x128xf32> -> vector<8x128xf32>
    %63 = arith.addf %62, %29 : vector<8x128xf32>
    %64 = vector.extract_strided_slice %63 {offsets = [0, 0], sizes = [8, 96], strides = [1, 1]} : vector<8x128xf32> to vector<8x96xf32>
    %65 = arith.negf %64 : vector<8x96xf32>
    %66 = math.exp %65 : vector<8x96xf32>
    %cst_42 = arith.constant 1.000000e+00 : f32
    %67 = vector.broadcast %cst_42 : f32 to vector<8x96xf32>
    %68 = arith.addf %67, %66 : vector<8x96xf32>
    %69 = arith.divf %67, %68 : vector<8x96xf32>
    %70 = vector.extract_strided_slice %69 {offsets = [0, 0], sizes = [8, 32], strides = [1, 1]} : vector<8x96xf32> to vector<8x32xf32>
    %71 = vector.extract_strided_slice %69 {offsets = [0, 32], sizes = [8, 32], strides = [1, 1]} : vector<8x96xf32> to vector<8x32xf32>
    %72 = vector.extract_strided_slice %69 {offsets = [0, 64], sizes = [8, 32], strides = [1, 1]} : vector<8x96xf32> to vector<8x32xf32>
    %73 = vector.extract_strided_slice %63 {offsets = [0, 96], sizes = [8, 32], strides = [1, 1]} : vector<8x128xf32> to vector<8x32xf32>
    %74 = math.tanh %73 : vector<8x32xf32>
    %75 = arith.mulf %71, %28 : vector<8x32xf32>
    %76 = arith.mulf %70, %74 : vector<8x32xf32>
    %77 = arith.addf %75, %76 : vector<8x32xf32>
    %78 = math.tanh %77 : vector<8x32xf32>
    %79 = arith.mulf %72, %78 : vector<8x32xf32>
    %80 = arith.truncf %79 : vector<8x32xf32> to vector<8x32xbf16>
    %cst_43 = arith.constant dense<0.000000e+00> : vector<8x133xf32>
    %81 = tpu.matmul %80, %8, %cst_43 {dimension_numbers = #tpu.dot_dimension_numbers<[1], [0], [0], [1], [0, 0, 1, 1], [], []>} : vector<8x32xbf16>, vector<32x133xbf16>, vector<8x133xf32> -> vector<8x133xf32>
    %82 = vector.extract_strided_slice %81 {offsets = [0, 0], sizes = [8, 128], strides = [1, 1]} : vector<8x133xf32> to vector<8x128xf32>
    %83 = vector.extract_strided_slice %81 {offsets = [0, 128], sizes = [8, 5], strides = [1, 1]} : vector<8x133xf32> to vector<8x5xf32>
    %84 = vector.broadcast %9 : vector<1x5xf32> to vector<8x5xf32>
    %85 = arith.addf %83, %84 : vector<8x5xf32>
    %86 = vector.extract_strided_slice %85 {offsets = [0, 0], sizes = [8, 4], strides = [1, 1]} : vector<8x5xf32> to vector<8x4xf32>
    %87 = vector.extract_strided_slice %85 {offsets = [0, 4], sizes = [8, 1], strides = [1, 1]} : vector<8x5xf32> to vector<8x1xf32>
    %88 = vector.extract_strided_slice %4 {offsets = [0, 0], sizes = [8, 4], strides = [1, 1]} : vector<40x4xf32> to vector<8x4xf32>
    %89 = arith.addf %86, %88 : vector<8x4xf32>
    %cst_44 = arith.constant dense<0xFF800000> : vector<8xf32>
    %90 = vector.multi_reduction <maximumf>, %89, %cst_44 [1] : vector<8x4xf32> to vector<8xf32>
    %91 = vector.shape_cast %90 : vector<8xf32> to vector<8x1xf32>
    %92 = vector.broadcast %91 : vector<8x1xf32> to vector<8x4xf32>
    %93 = arith.cmpf oge, %89, %92 : vector<8x4xf32>
    %c4_i32 = arith.constant 4 : i32
    %94 = vector.broadcast %c4_i32 : i32 to vector<8x4xi32>
    %95 = arith.select %93, %23, %94 : vector<8x4xi1>, vector<8x4xi32>
    %cst_45 = arith.constant dense<2147483647> : vector<8xi32>
    %96 = vector.multi_reduction <minsi>, %95, %cst_45 [1] : vector<8x4xi32> to vector<8xi32>
    %97 = vector.shape_cast %96 : vector<8xi32> to vector<8x1xi32>
    %c1_i32_46 = arith.constant 1 : i32
    %98 = vector.broadcast %c1_i32_46 : i32 to vector<8x1xi32>
    %99 = arith.addi %45, %98 : vector<8x1xi32>
    %100 = arith.addi %99, %97 : vector<8x1xi32>
    %cst_47 = arith.constant dense<0xFF800000> : vector<8xf32>
    %101 = vector.multi_reduction <maximumf>, %86, %cst_47 [1] : vector<8x4xf32> to vector<8xf32>
    %102 = vector.shape_cast %101 : vector<8xf32> to vector<8x1xf32>
    %103 = vector.broadcast %102 : vector<8x1xf32> to vector<8x4xf32>
    %104 = arith.subf %86, %103 : vector<8x4xf32>
    %105 = math.exp %104 : vector<8x4xf32>
    %cst_48 = arith.constant dense<0.000000e+00> : vector<8xf32>
    %106 = vector.multi_reduction <add>, %105, %cst_48 [1] : vector<8x4xf32> to vector<8xf32>
    %107 = vector.shape_cast %106 : vector<8xf32> to vector<8x1xf32>
    %108 = math.log %107 : vector<8x1xf32>
    %109 = arith.addf %102, %108 : vector<8x1xf32>
    %110 = vector.broadcast %97 : vector<8x1xi32> to vector<8x4xi32>
    %111 = arith.cmpi eq, %23, %110 : vector<8x4xi32>
    %cst_49 = arith.constant 0.000000e+00 : f32
    %112 = vector.broadcast %cst_49 : f32 to vector<8x4xf32>
    %113 = arith.select %111, %86, %112 : vector<8x4xi1>, vector<8x4xf32>
    %cst_50 = arith.constant dense<0.000000e+00> : vector<8xf32>
    %114 = vector.multi_reduction <add>, %113, %cst_50 [1] : vector<8x4xf32> to vector<8xf32>
    %115 = vector.shape_cast %114 : vector<8xf32> to vector<8x1xf32>
    %116 = arith.subf %115, %109 : vector<8x1xf32>
    %cst_51 = arith.constant 1.000000e+00 : f32
    %117 = vector.broadcast %cst_51 : f32 to vector<8x1xf32>
    %118 = arith.subf %117, %42 : vector<8x1xf32>
    %119 = vector.broadcast %33 : vector<1x1xf32> to vector<8x1xf32>
    %120 = arith.mulf %119, %118 : vector<8x1xf32>
    %121 = arith.mulf %120, %116 : vector<8x1xf32>
    %122 = arith.addf %35, %121 : vector<8x1xf32>
    %123 = arith.mulf %120, %87 : vector<8x1xf32>
    %124 = arith.addf %36, %123 : vector<8x1xf32>
    %125 = arith.mulf %87, %116 : vector<8x1xf32>
    %126 = arith.mulf %120, %125 : vector<8x1xf32>
    %127 = arith.addf %37, %126 : vector<8x1xf32>
    %128 = arith.mulf %87, %87 : vector<8x1xf32>
    %129 = arith.mulf %120, %128 : vector<8x1xf32>
    %130 = arith.addf %38, %129 : vector<8x1xf32>
    %131 = arith.addf %39, %120 : vector<8x1xf32>
    %132 = arith.addf %34, %33 : vector<1x1xf32>
    %133 = arith.subf %79, %27 : vector<8x32xf32>
    %134 = vector.broadcast %33 : vector<1x1xf32> to vector<8x32xf32>
    %135 = arith.mulf %134, %133 : vector<8x32xf32>
    %136 = arith.addf %27, %135 : vector<8x32xf32>
    %137 = arith.subf %77, %28 : vector<8x32xf32>
    %138 = vector.broadcast %33 : vector<1x1xf32> to vector<8x32xf32>
    %139 = arith.mulf %138, %137 : vector<8x32xf32>
    %140 = arith.addf %28, %139 : vector<8x32xf32>
    %141 = arith.subf %82, %29 : vector<8x128xf32>
    %142 = vector.broadcast %33 : vector<1x1xf32> to vector<8x128xf32>
    %143 = arith.mulf %142, %141 : vector<8x128xf32>
    %144 = arith.addf %29, %143 : vector<8x128xf32>
    %145 = arith.fptosi %33 : vector<1x1xf32> to vector<1x1xi32>
    %146 = arith.subi %100, %32 : vector<8x1xi32>
    %147 = vector.broadcast %145 : vector<1x1xi32> to vector<8x1xi32>
    %148 = arith.muli %147, %146 : vector<8x1xi32>
    %149 = arith.addi %32, %148 : vector<8x1xi32>
    %150 = arith.cmpi sge, %100, %2 : vector<8x1xi32>
    %151 = arith.extui %150 : vector<8x1xi1> to vector<8x1xi32>
    %152 = arith.sitofp %151 : vector<8x1xi32> to vector<8x1xf32>
    %cst_52 = arith.constant dense<0x7F800000> : vector<1xf32>
    %153 = vector.multi_reduction <minimumf>, %152, %cst_52 [0] : vector<8x1xf32> to vector<1xf32>
    %154 = vector.shape_cast %153 : vector<1xf32> to vector<1x1xf32>
    %cst_53 = arith.constant 1.000000e+00 : f32
    %155 = vector.broadcast %cst_53 : f32 to vector<1x1xf32>
    %156 = arith.subf %155, %154 : vector<1x1xf32>
    %157 = arith.mulf %33, %156 : vector<1x1xf32>
    %158 = arith.cmpi sge, %149, %2 : vector<8x1xi32>
    %159 = arith.extui %158 : vector<8x1xi1> to vector<8x1xi32>
    %160 = arith.sitofp %159 : vector<8x1xi32> to vector<8x1xf32>
    %c1_i32_54 = arith.constant 1 : i32
    %161 = vector.broadcast %c1_i32_54 : i32 to vector<8x1xi32>
    %162 = arith.subi %2, %161 : vector<8x1xi32>
    %163 = arith.select %158, %162, %149 : vector<8x1xi1>, vector<8x1xi32>
    %164 = vector.broadcast %157 : vector<1x1xf32> to vector<8x1xf32>
    %165 = arith.mulf %164, %160 : vector<8x1xf32>
    %cst_55 = arith.constant 1.000000e+00 : f32
    %166 = vector.broadcast %cst_55 : f32 to vector<8x1xf32>
    %167 = arith.subf %166, %55 : vector<8x1xf32>
    %168 = arith.mulf %165, %167 : vector<8x1xf32>
    %169 = arith.subf %136, %54 : vector<8x32xf32>
    %170 = vector.broadcast %168 : vector<8x1xf32> to vector<8x32xf32>
    %171 = arith.mulf %170, %169 : vector<8x32xf32>
    %172 = arith.addf %54, %171 : vector<8x32xf32>
    %173 = arith.addf %55, %168 : vector<8x1xf32>
    %174 = arith.addi %163, %22 : vector<8x1xi32>
    %175 = vector.broadcast %174 : vector<8x1xi32> to vector<8x128xi32>
    %176 = arith.cmpi eq, %19, %175 : vector<8x128xi32>
    %177 = arith.extui %176 : vector<8x128xi1> to vector<8x128xi32>
    %178 = arith.sitofp %177 : vector<8x128xi32> to vector<8x128xf32>
    %179 = arith.truncf %178 : vector<8x128xf32> to vector<8x128xbf16>
    %cst_56 = arith.constant dense<0.000000e+00> : vector<8x128xf32>
    %180 = tpu.matmul %179, %18, %cst_56 {dimension_numbers = #tpu.dot_dimension_numbers<[1], [0], [0], [1], [0, 0, 1, 1], [], []>} : vector<8x128xbf16>, vector<128x128xbf16>, vector<8x128xf32> -> vector<8x128xf32>
    %181 = arith.addf %180, %144 : vector<8x128xf32>
    %182 = vector.extract_strided_slice %181 {offsets = [0, 0], sizes = [8, 96], strides = [1, 1]} : vector<8x128xf32> to vector<8x96xf32>
    %183 = arith.negf %182 : vector<8x96xf32>
    %184 = math.exp %183 : vector<8x96xf32>
    %cst_57 = arith.constant 1.000000e+00 : f32
    %185 = vector.broadcast %cst_57 : f32 to vector<8x96xf32>
    %186 = arith.addf %185, %184 : vector<8x96xf32>
    %187 = arith.divf %185, %186 : vector<8x96xf32>
    %188 = vector.extract_strided_slice %187 {offsets = [0, 0], sizes = [8, 32], strides = [1, 1]} : vector<8x96xf32> to vector<8x32xf32>
    %189 = vector.extract_strided_slice %187 {offsets = [0, 32], sizes = [8, 32], strides = [1, 1]} : vector<8x96xf32> to vector<8x32xf32>
    %190 = vector.extract_strided_slice %187 {offsets = [0, 64], sizes = [8, 32], strides = [1, 1]} : vector<8x96xf32> to vector<8x32xf32>
    %191 = vector.extract_strided_slice %181 {offsets = [0, 96], sizes = [8, 32], strides = [1, 1]} : vector<8x128xf32> to vector<8x32xf32>
    %192 = math.tanh %191 : vector<8x32xf32>
    %193 = arith.mulf %189, %140 : vector<8x32xf32>
    %194 = arith.mulf %188, %192 : vector<8x32xf32>
    %195 = arith.addf %193, %194 : vector<8x32xf32>
    %196 = math.tanh %195 : vector<8x32xf32>
    %197 = arith.mulf %190, %196 : vector<8x32xf32>
    %198 = arith.truncf %197 : vector<8x32xf32> to vector<8x32xbf16>
    %cst_58 = arith.constant dense<0.000000e+00> : vector<8x133xf32>
    %199 = tpu.matmul %198, %8, %cst_58 {dimension_numbers = #tpu.dot_dimension_numbers<[1], [0], [0], [1], [0, 0, 1, 1], [], []>} : vector<8x32xbf16>, vector<32x133xbf16>, vector<8x133xf32> -> vector<8x133xf32>
    %200 = vector.extract_strided_slice %199 {offsets = [0, 0], sizes = [8, 128], strides = [1, 1]} : vector<8x133xf32> to vector<8x128xf32>
    %201 = vector.extract_strided_slice %199 {offsets = [0, 128], sizes = [8, 5], strides = [1, 1]} : vector<8x133xf32> to vector<8x5xf32>
    %202 = vector.broadcast %9 : vector<1x5xf32> to vector<8x5xf32>
    %203 = arith.addf %201, %202 : vector<8x5xf32>
    %204 = vector.extract_strided_slice %203 {offsets = [0, 0], sizes = [8, 4], strides = [1, 1]} : vector<8x5xf32> to vector<8x4xf32>
    %205 = vector.extract_strided_slice %203 {offsets = [0, 4], sizes = [8, 1], strides = [1, 1]} : vector<8x5xf32> to vector<8x1xf32>
    %206 = vector.extract_strided_slice %4 {offsets = [8, 0], sizes = [8, 4], strides = [1, 1]} : vector<40x4xf32> to vector<8x4xf32>
    %207 = arith.addf %204, %206 : vector<8x4xf32>
    %cst_59 = arith.constant dense<0xFF800000> : vector<8xf32>
    %208 = vector.multi_reduction <maximumf>, %207, %cst_59 [1] : vector<8x4xf32> to vector<8xf32>
    %209 = vector.shape_cast %208 : vector<8xf32> to vector<8x1xf32>
    %210 = vector.broadcast %209 : vector<8x1xf32> to vector<8x4xf32>
    %211 = arith.cmpf oge, %207, %210 : vector<8x4xf32>
    %c4_i32_60 = arith.constant 4 : i32
    %212 = vector.broadcast %c4_i32_60 : i32 to vector<8x4xi32>
    %213 = arith.select %211, %23, %212 : vector<8x4xi1>, vector<8x4xi32>
    %cst_61 = arith.constant dense<2147483647> : vector<8xi32>
    %214 = vector.multi_reduction <minsi>, %213, %cst_61 [1] : vector<8x4xi32> to vector<8xi32>
    %215 = vector.shape_cast %214 : vector<8xi32> to vector<8x1xi32>
    %c1_i32_62 = arith.constant 1 : i32
    %216 = vector.broadcast %c1_i32_62 : i32 to vector<8x1xi32>
    %217 = arith.addi %163, %216 : vector<8x1xi32>
    %218 = arith.addi %217, %215 : vector<8x1xi32>
    %cst_63 = arith.constant dense<0xFF800000> : vector<8xf32>
    %219 = vector.multi_reduction <maximumf>, %204, %cst_63 [1] : vector<8x4xf32> to vector<8xf32>
    %220 = vector.shape_cast %219 : vector<8xf32> to vector<8x1xf32>
    %221 = vector.broadcast %220 : vector<8x1xf32> to vector<8x4xf32>
    %222 = arith.subf %204, %221 : vector<8x4xf32>
    %223 = math.exp %222 : vector<8x4xf32>
    %cst_64 = arith.constant dense<0.000000e+00> : vector<8xf32>
    %224 = vector.multi_reduction <add>, %223, %cst_64 [1] : vector<8x4xf32> to vector<8xf32>
    %225 = vector.shape_cast %224 : vector<8xf32> to vector<8x1xf32>
    %226 = math.log %225 : vector<8x1xf32>
    %227 = arith.addf %220, %226 : vector<8x1xf32>
    %228 = vector.broadcast %215 : vector<8x1xi32> to vector<8x4xi32>
    %229 = arith.cmpi eq, %23, %228 : vector<8x4xi32>
    %cst_65 = arith.constant 0.000000e+00 : f32
    %230 = vector.broadcast %cst_65 : f32 to vector<8x4xf32>
    %231 = arith.select %229, %204, %230 : vector<8x4xi1>, vector<8x4xf32>
    %cst_66 = arith.constant dense<0.000000e+00> : vector<8xf32>
    %232 = vector.multi_reduction <add>, %231, %cst_66 [1] : vector<8x4xf32> to vector<8xf32>
    %233 = vector.shape_cast %232 : vector<8xf32> to vector<8x1xf32>
    %234 = arith.subf %233, %227 : vector<8x1xf32>
    %cst_67 = arith.constant 1.000000e+00 : f32
    %235 = vector.broadcast %cst_67 : f32 to vector<8x1xf32>
    %236 = arith.subf %235, %160 : vector<8x1xf32>
    %237 = vector.broadcast %157 : vector<1x1xf32> to vector<8x1xf32>
    %238 = arith.mulf %237, %236 : vector<8x1xf32>
    %239 = arith.mulf %238, %234 : vector<8x1xf32>
    %240 = arith.addf %122, %239 : vector<8x1xf32>
    %241 = arith.mulf %238, %205 : vector<8x1xf32>
    %242 = arith.addf %124, %241 : vector<8x1xf32>
    %243 = arith.mulf %205, %234 : vector<8x1xf32>
    %244 = arith.mulf %238, %243 : vector<8x1xf32>
    %245 = arith.addf %127, %244 : vector<8x1xf32>
    %246 = arith.mulf %205, %205 : vector<8x1xf32>
    %247 = arith.mulf %238, %246 : vector<8x1xf32>
    %248 = arith.addf %130, %247 : vector<8x1xf32>
    %249 = arith.addf %131, %238 : vector<8x1xf32>
    %250 = arith.addf %132, %157 : vector<1x1xf32>
    %251 = arith.subf %197, %136 : vector<8x32xf32>
    %252 = vector.broadcast %157 : vector<1x1xf32> to vector<8x32xf32>
    %253 = arith.mulf %252, %251 : vector<8x32xf32>
    %254 = arith.addf %136, %253 : vector<8x32xf32>
    %255 = arith.subf %195, %140 : vector<8x32xf32>
    %256 = vector.broadcast %157 : vector<1x1xf32> to vector<8x32xf32>
    %257 = arith.mulf %256, %255 : vector<8x32xf32>
    %258 = arith.addf %140, %257 : vector<8x32xf32>
    %259 = arith.subf %200, %144 : vector<8x128xf32>
    %260 = vector.broadcast %157 : vector<1x1xf32> to vector<8x128xf32>
    %261 = arith.mulf %260, %259 : vector<8x128xf32>
    %262 = arith.addf %144, %261 : vector<8x128xf32>
    %263 = arith.fptosi %157 : vector<1x1xf32> to vector<1x1xi32>
    %264 = arith.subi %218, %149 : vector<8x1xi32>
    %265 = vector.broadcast %263 : vector<1x1xi32> to vector<8x1xi32>
    %266 = arith.muli %265, %264 : vector<8x1xi32>
    %267 = arith.addi %149, %266 : vector<8x1xi32>
    %268 = arith.cmpi sge, %218, %2 : vector<8x1xi32>
    %269 = arith.extui %268 : vector<8x1xi1> to vector<8x1xi32>
    %270 = arith.sitofp %269 : vector<8x1xi32> to vector<8x1xf32>
    %cst_68 = arith.constant dense<0x7F800000> : vector<1xf32>
    %271 = vector.multi_reduction <minimumf>, %270, %cst_68 [0] : vector<8x1xf32> to vector<1xf32>
    %272 = vector.shape_cast %271 : vector<1xf32> to vector<1x1xf32>
    %cst_69 = arith.constant 1.000000e+00 : f32
    %273 = vector.broadcast %cst_69 : f32 to vector<1x1xf32>
    %274 = arith.subf %273, %272 : vector<1x1xf32>
    %275 = arith.mulf %157, %274 : vector<1x1xf32>
    %276 = arith.cmpi sge, %267, %2 : vector<8x1xi32>
    %277 = arith.extui %276 : vector<8x1xi1> to vector<8x1xi32>
    %278 = arith.sitofp %277 : vector<8x1xi32> to vector<8x1xf32>
    %c1_i32_70 = arith.constant 1 : i32
    %279 = vector.broadcast %c1_i32_70 : i32 to vector<8x1xi32>
    %280 = arith.subi %2, %279 : vector<8x1xi32>
    %281 = arith.select %276, %280, %267 : vector<8x1xi1>, vector<8x1xi32>
    %282 = vector.broadcast %275 : vector<1x1xf32> to vector<8x1xf32>
    %283 = arith.mulf %282, %278 : vector<8x1xf32>
    %cst_71 = arith.constant 1.000000e+00 : f32
    %284 = vector.broadcast %cst_71 : f32 to vector<8x1xf32>
    %285 = arith.subf %284, %173 : vector<8x1xf32>
    %286 = arith.mulf %283, %285 : vector<8x1xf32>
    %287 = arith.subf %254, %172 : vector<8x32xf32>
    %288 = vector.broadcast %286 : vector<8x1xf32> to vector<8x32xf32>
    %289 = arith.mulf %288, %287 : vector<8x32xf32>
    %290 = arith.addf %172, %289 : vector<8x32xf32>
    %291 = arith.addf %173, %286 : vector<8x1xf32>
    %292 = arith.addi %281, %22 : vector<8x1xi32>
    %293 = vector.broadcast %292 : vector<8x1xi32> to vector<8x128xi32>
    %294 = arith.cmpi eq, %19, %293 : vector<8x128xi32>
    %295 = arith.extui %294 : vector<8x128xi1> to vector<8x128xi32>
    %296 = arith.sitofp %295 : vector<8x128xi32> to vector<8x128xf32>
    %297 = arith.truncf %296 : vector<8x128xf32> to vector<8x128xbf16>
    %cst_72 = arith.constant dense<0.000000e+00> : vector<8x128xf32>
    %298 = tpu.matmul %297, %18, %cst_72 {dimension_numbers = #tpu.dot_dimension_numbers<[1], [0], [0], [1], [0, 0, 1, 1], [], []>} : vector<8x128xbf16>, vector<128x128xbf16>, vector<8x128xf32> -> vector<8x128xf32>
    %299 = arith.addf %298, %262 : vector<8x128xf32>
    %300 = vector.extract_strided_slice %299 {offsets = [0, 0], sizes = [8, 96], strides = [1, 1]} : vector<8x128xf32> to vector<8x96xf32>
    %301 = arith.negf %300 : vector<8x96xf32>
    %302 = math.exp %301 : vector<8x96xf32>
    %cst_73 = arith.constant 1.000000e+00 : f32
    %303 = vector.broadcast %cst_73 : f32 to vector<8x96xf32>
    %304 = arith.addf %303, %302 : vector<8x96xf32>
    %305 = arith.divf %303, %304 : vector<8x96xf32>
    %306 = vector.extract_strided_slice %305 {offsets = [0, 0], sizes = [8, 32], strides = [1, 1]} : vector<8x96xf32> to vector<8x32xf32>
    %307 = vector.extract_strided_slice %305 {offsets = [0, 32], sizes = [8, 32], strides = [1, 1]} : vector<8x96xf32> to vector<8x32xf32>
    %308 = vector.extract_strided_slice %305 {offsets = [0, 64], sizes = [8, 32], strides = [1, 1]} : vector<8x96xf32> to vector<8x32xf32>
    %309 = vector.extract_strided_slice %299 {offsets = [0, 96], sizes = [8, 32], strides = [1, 1]} : vector<8x128xf32> to vector<8x32xf32>
    %310 = math.tanh %309 : vector<8x32xf32>
    %311 = arith.mulf %307, %258 : vector<8x32xf32>
    %312 = arith.mulf %306, %310 : vector<8x32xf32>
    %313 = arith.addf %311, %312 : vector<8x32xf32>
    %314 = math.tanh %313 : vector<8x32xf32>
    %315 = arith.mulf %308, %314 : vector<8x32xf32>
    %316 = arith.truncf %315 : vector<8x32xf32> to vector<8x32xbf16>
    %cst_74 = arith.constant dense<0.000000e+00> : vector<8x133xf32>
    %317 = tpu.matmul %316, %8, %cst_74 {dimension_numbers = #tpu.dot_dimension_numbers<[1], [0], [0], [1], [0, 0, 1, 1], [], []>} : vector<8x32xbf16>, vector<32x133xbf16>, vector<8x133xf32> -> vector<8x133xf32>
    %318 = vector.extract_strided_slice %317 {offsets = [0, 0], sizes = [8, 128], strides = [1, 1]} : vector<8x133xf32> to vector<8x128xf32>
    %319 = vector.extract_strided_slice %317 {offsets = [0, 128], sizes = [8, 5], strides = [1, 1]} : vector<8x133xf32> to vector<8x5xf32>
    %320 = vector.broadcast %9 : vector<1x5xf32> to vector<8x5xf32>
    %321 = arith.addf %319, %320 : vector<8x5xf32>
    %322 = vector.extract_strided_slice %321 {offsets = [0, 0], sizes = [8, 4], strides = [1, 1]} : vector<8x5xf32> to vector<8x4xf32>
    %323 = vector.extract_strided_slice %321 {offsets = [0, 4], sizes = [8, 1], strides = [1, 1]} : vector<8x5xf32> to vector<8x1xf32>
    %324 = vector.extract_strided_slice %4 {offsets = [16, 0], sizes = [8, 4], strides = [1, 1]} : vector<40x4xf32> to vector<8x4xf32>
    %325 = arith.addf %322, %324 : vector<8x4xf32>
    %cst_75 = arith.constant dense<0xFF800000> : vector<8xf32>
    %326 = vector.multi_reduction <maximumf>, %325, %cst_75 [1] : vector<8x4xf32> to vector<8xf32>
    %327 = vector.shape_cast %326 : vector<8xf32> to vector<8x1xf32>
    %328 = vector.broadcast %327 : vector<8x1xf32> to vector<8x4xf32>
    %329 = arith.cmpf oge, %325, %328 : vector<8x4xf32>
    %c4_i32_76 = arith.constant 4 : i32
    %330 = vector.broadcast %c4_i32_76 : i32 to vector<8x4xi32>
    %331 = arith.select %329, %23, %330 : vector<8x4xi1>, vector<8x4xi32>
    %cst_77 = arith.constant dense<2147483647> : vector<8xi32>
    %332 = vector.multi_reduction <minsi>, %331, %cst_77 [1] : vector<8x4xi32> to vector<8xi32>
    %333 = vector.shape_cast %332 : vector<8xi32> to vector<8x1xi32>
    %c1_i32_78 = arith.constant 1 : i32
    %334 = vector.broadcast %c1_i32_78 : i32 to vector<8x1xi32>
    %335 = arith.addi %281, %334 : vector<8x1xi32>
    %336 = arith.addi %335, %333 : vector<8x1xi32>
    %cst_79 = arith.constant dense<0xFF800000> : vector<8xf32>
    %337 = vector.multi_reduction <maximumf>, %322, %cst_79 [1] : vector<8x4xf32> to vector<8xf32>
    %338 = vector.shape_cast %337 : vector<8xf32> to vector<8x1xf32>
    %339 = vector.broadcast %338 : vector<8x1xf32> to vector<8x4xf32>
    %340 = arith.subf %322, %339 : vector<8x4xf32>
    %341 = math.exp %340 : vector<8x4xf32>
    %cst_80 = arith.constant dense<0.000000e+00> : vector<8xf32>
    %342 = vector.multi_reduction <add>, %341, %cst_80 [1] : vector<8x4xf32> to vector<8xf32>
    %343 = vector.shape_cast %342 : vector<8xf32> to vector<8x1xf32>
    %344 = math.log %343 : vector<8x1xf32>
    %345 = arith.addf %338, %344 : vector<8x1xf32>
    %346 = vector.broadcast %333 : vector<8x1xi32> to vector<8x4xi32>
    %347 = arith.cmpi eq, %23, %346 : vector<8x4xi32>
    %cst_81 = arith.constant 0.000000e+00 : f32
    %348 = vector.broadcast %cst_81 : f32 to vector<8x4xf32>
    %349 = arith.select %347, %322, %348 : vector<8x4xi1>, vector<8x4xf32>
    %cst_82 = arith.constant dense<0.000000e+00> : vector<8xf32>
    %350 = vector.multi_reduction <add>, %349, %cst_82 [1] : vector<8x4xf32> to vector<8xf32>
    %351 = vector.shape_cast %350 : vector<8xf32> to vector<8x1xf32>
    %352 = arith.subf %351, %345 : vector<8x1xf32>
    %cst_83 = arith.constant 1.000000e+00 : f32
    %353 = vector.broadcast %cst_83 : f32 to vector<8x1xf32>
    %354 = arith.subf %353, %278 : vector<8x1xf32>
    %355 = vector.broadcast %275 : vector<1x1xf32> to vector<8x1xf32>
    %356 = arith.mulf %355, %354 : vector<8x1xf32>
    %357 = arith.mulf %356, %352 : vector<8x1xf32>
    %358 = arith.addf %240, %357 : vector<8x1xf32>
    %359 = arith.mulf %356, %323 : vector<8x1xf32>
    %360 = arith.addf %242, %359 : vector<8x1xf32>
    %361 = arith.mulf %323, %352 : vector<8x1xf32>
    %362 = arith.mulf %356, %361 : vector<8x1xf32>
    %363 = arith.addf %245, %362 : vector<8x1xf32>
    %364 = arith.mulf %323, %323 : vector<8x1xf32>
    %365 = arith.mulf %356, %364 : vector<8x1xf32>
    %366 = arith.addf %248, %365 : vector<8x1xf32>
    %367 = arith.addf %249, %356 : vector<8x1xf32>
    %368 = arith.addf %250, %275 : vector<1x1xf32>
    %369 = arith.subf %315, %254 : vector<8x32xf32>
    %370 = vector.broadcast %275 : vector<1x1xf32> to vector<8x32xf32>
    %371 = arith.mulf %370, %369 : vector<8x32xf32>
    %372 = arith.addf %254, %371 : vector<8x32xf32>
    %373 = arith.subf %313, %258 : vector<8x32xf32>
    %374 = vector.broadcast %275 : vector<1x1xf32> to vector<8x32xf32>
    %375 = arith.mulf %374, %373 : vector<8x32xf32>
    %376 = arith.addf %258, %375 : vector<8x32xf32>
    %377 = arith.subf %318, %262 : vector<8x128xf32>
    %378 = vector.broadcast %275 : vector<1x1xf32> to vector<8x128xf32>
    %379 = arith.mulf %378, %377 : vector<8x128xf32>
    %380 = arith.addf %262, %379 : vector<8x128xf32>
    %381 = arith.fptosi %275 : vector<1x1xf32> to vector<1x1xi32>
    %382 = arith.subi %336, %267 : vector<8x1xi32>
    %383 = vector.broadcast %381 : vector<1x1xi32> to vector<8x1xi32>
    %384 = arith.muli %383, %382 : vector<8x1xi32>
    %385 = arith.addi %267, %384 : vector<8x1xi32>
    %386 = arith.cmpi sge, %336, %2 : vector<8x1xi32>
    %387 = arith.extui %386 : vector<8x1xi1> to vector<8x1xi32>
    %388 = arith.sitofp %387 : vector<8x1xi32> to vector<8x1xf32>
    %cst_84 = arith.constant dense<0x7F800000> : vector<1xf32>
    %389 = vector.multi_reduction <minimumf>, %388, %cst_84 [0] : vector<8x1xf32> to vector<1xf32>
    %390 = vector.shape_cast %389 : vector<1xf32> to vector<1x1xf32>
    %cst_85 = arith.constant 1.000000e+00 : f32
    %391 = vector.broadcast %cst_85 : f32 to vector<1x1xf32>
    %392 = arith.subf %391, %390 : vector<1x1xf32>
    %393 = arith.mulf %275, %392 : vector<1x1xf32>
    %394 = arith.cmpi sge, %385, %2 : vector<8x1xi32>
    %395 = arith.extui %394 : vector<8x1xi1> to vector<8x1xi32>
    %396 = arith.sitofp %395 : vector<8x1xi32> to vector<8x1xf32>
    %c1_i32_86 = arith.constant 1 : i32
    %397 = vector.broadcast %c1_i32_86 : i32 to vector<8x1xi32>
    %398 = arith.subi %2, %397 : vector<8x1xi32>
    %399 = arith.select %394, %398, %385 : vector<8x1xi1>, vector<8x1xi32>
    %400 = vector.broadcast %393 : vector<1x1xf32> to vector<8x1xf32>
    %401 = arith.mulf %400, %396 : vector<8x1xf32>
    %cst_87 = arith.constant 1.000000e+00 : f32
    %402 = vector.broadcast %cst_87 : f32 to vector<8x1xf32>
    %403 = arith.subf %402, %291 : vector<8x1xf32>
    %404 = arith.mulf %401, %403 : vector<8x1xf32>
    %405 = arith.subf %372, %290 : vector<8x32xf32>
    %406 = vector.broadcast %404 : vector<8x1xf32> to vector<8x32xf32>
    %407 = arith.mulf %406, %405 : vector<8x32xf32>
    %408 = arith.addf %290, %407 : vector<8x32xf32>
    %409 = arith.addf %291, %404 : vector<8x1xf32>
    %410 = arith.addi %399, %22 : vector<8x1xi32>
    %411 = vector.broadcast %410 : vector<8x1xi32> to vector<8x128xi32>
    %412 = arith.cmpi eq, %19, %411 : vector<8x128xi32>
    %413 = arith.extui %412 : vector<8x128xi1> to vector<8x128xi32>
    %414 = arith.sitofp %413 : vector<8x128xi32> to vector<8x128xf32>
    %415 = arith.truncf %414 : vector<8x128xf32> to vector<8x128xbf16>
    %cst_88 = arith.constant dense<0.000000e+00> : vector<8x128xf32>
    %416 = tpu.matmul %415, %18, %cst_88 {dimension_numbers = #tpu.dot_dimension_numbers<[1], [0], [0], [1], [0, 0, 1, 1], [], []>} : vector<8x128xbf16>, vector<128x128xbf16>, vector<8x128xf32> -> vector<8x128xf32>
    %417 = arith.addf %416, %380 : vector<8x128xf32>
    %418 = vector.extract_strided_slice %417 {offsets = [0, 0], sizes = [8, 96], strides = [1, 1]} : vector<8x128xf32> to vector<8x96xf32>
    %419 = arith.negf %418 : vector<8x96xf32>
    %420 = math.exp %419 : vector<8x96xf32>
    %cst_89 = arith.constant 1.000000e+00 : f32
    %421 = vector.broadcast %cst_89 : f32 to vector<8x96xf32>
    %422 = arith.addf %421, %420 : vector<8x96xf32>
    %423 = arith.divf %421, %422 : vector<8x96xf32>
    %424 = vector.extract_strided_slice %423 {offsets = [0, 0], sizes = [8, 32], strides = [1, 1]} : vector<8x96xf32> to vector<8x32xf32>
    %425 = vector.extract_strided_slice %423 {offsets = [0, 32], sizes = [8, 32], strides = [1, 1]} : vector<8x96xf32> to vector<8x32xf32>
    %426 = vector.extract_strided_slice %423 {offsets = [0, 64], sizes = [8, 32], strides = [1, 1]} : vector<8x96xf32> to vector<8x32xf32>
    %427 = vector.extract_strided_slice %417 {offsets = [0, 96], sizes = [8, 32], strides = [1, 1]} : vector<8x128xf32> to vector<8x32xf32>
    %428 = math.tanh %427 : vector<8x32xf32>
    %429 = arith.mulf %425, %376 : vector<8x32xf32>
    %430 = arith.mulf %424, %428 : vector<8x32xf32>
    %431 = arith.addf %429, %430 : vector<8x32xf32>
    %432 = math.tanh %431 : vector<8x32xf32>
    %433 = arith.mulf %426, %432 : vector<8x32xf32>
    %434 = arith.truncf %433 : vector<8x32xf32> to vector<8x32xbf16>
    %cst_90 = arith.constant dense<0.000000e+00> : vector<8x133xf32>
    %435 = tpu.matmul %434, %8, %cst_90 {dimension_numbers = #tpu.dot_dimension_numbers<[1], [0], [0], [1], [0, 0, 1, 1], [], []>} : vector<8x32xbf16>, vector<32x133xbf16>, vector<8x133xf32> -> vector<8x133xf32>
    %436 = vector.extract_strided_slice %435 {offsets = [0, 0], sizes = [8, 128], strides = [1, 1]} : vector<8x133xf32> to vector<8x128xf32>
    %437 = vector.extract_strided_slice %435 {offsets = [0, 128], sizes = [8, 5], strides = [1, 1]} : vector<8x133xf32> to vector<8x5xf32>
    %438 = vector.broadcast %9 : vector<1x5xf32> to vector<8x5xf32>
    %439 = arith.addf %437, %438 : vector<8x5xf32>
    %440 = vector.extract_strided_slice %439 {offsets = [0, 0], sizes = [8, 4], strides = [1, 1]} : vector<8x5xf32> to vector<8x4xf32>
    %441 = vector.extract_strided_slice %439 {offsets = [0, 4], sizes = [8, 1], strides = [1, 1]} : vector<8x5xf32> to vector<8x1xf32>
    %442 = vector.extract_strided_slice %4 {offsets = [24, 0], sizes = [8, 4], strides = [1, 1]} : vector<40x4xf32> to vector<8x4xf32>
    %443 = arith.addf %440, %442 : vector<8x4xf32>
    %cst_91 = arith.constant dense<0xFF800000> : vector<8xf32>
    %444 = vector.multi_reduction <maximumf>, %443, %cst_91 [1] : vector<8x4xf32> to vector<8xf32>
    %445 = vector.shape_cast %444 : vector<8xf32> to vector<8x1xf32>
    %446 = vector.broadcast %445 : vector<8x1xf32> to vector<8x4xf32>
    %447 = arith.cmpf oge, %443, %446 : vector<8x4xf32>
    %c4_i32_92 = arith.constant 4 : i32
    %448 = vector.broadcast %c4_i32_92 : i32 to vector<8x4xi32>
    %449 = arith.select %447, %23, %448 : vector<8x4xi1>, vector<8x4xi32>
    %cst_93 = arith.constant dense<2147483647> : vector<8xi32>
    %450 = vector.multi_reduction <minsi>, %449, %cst_93 [1] : vector<8x4xi32> to vector<8xi32>
    %451 = vector.shape_cast %450 : vector<8xi32> to vector<8x1xi32>
    %c1_i32_94 = arith.constant 1 : i32
    %452 = vector.broadcast %c1_i32_94 : i32 to vector<8x1xi32>
    %453 = arith.addi %399, %452 : vector<8x1xi32>
    %454 = arith.addi %453, %451 : vector<8x1xi32>
    %cst_95 = arith.constant dense<0xFF800000> : vector<8xf32>
    %455 = vector.multi_reduction <maximumf>, %440, %cst_95 [1] : vector<8x4xf32> to vector<8xf32>
    %456 = vector.shape_cast %455 : vector<8xf32> to vector<8x1xf32>
    %457 = vector.broadcast %456 : vector<8x1xf32> to vector<8x4xf32>
    %458 = arith.subf %440, %457 : vector<8x4xf32>
    %459 = math.exp %458 : vector<8x4xf32>
    %cst_96 = arith.constant dense<0.000000e+00> : vector<8xf32>
    %460 = vector.multi_reduction <add>, %459, %cst_96 [1] : vector<8x4xf32> to vector<8xf32>
    %461 = vector.shape_cast %460 : vector<8xf32> to vector<8x1xf32>
    %462 = math.log %461 : vector<8x1xf32>
    %463 = arith.addf %456, %462 : vector<8x1xf32>
    %464 = vector.broadcast %451 : vector<8x1xi32> to vector<8x4xi32>
    %465 = arith.cmpi eq, %23, %464 : vector<8x4xi32>
    %cst_97 = arith.constant 0.000000e+00 : f32
    %466 = vector.broadcast %cst_97 : f32 to vector<8x4xf32>
    %467 = arith.select %465, %440, %466 : vector<8x4xi1>, vector<8x4xf32>
    %cst_98 = arith.constant dense<0.000000e+00> : vector<8xf32>
    %468 = vector.multi_reduction <add>, %467, %cst_98 [1] : vector<8x4xf32> to vector<8xf32>
    %469 = vector.shape_cast %468 : vector<8xf32> to vector<8x1xf32>
    %470 = arith.subf %469, %463 : vector<8x1xf32>
    %cst_99 = arith.constant 1.000000e+00 : f32
    %471 = vector.broadcast %cst_99 : f32 to vector<8x1xf32>
    %472 = arith.subf %471, %396 : vector<8x1xf32>
    %473 = vector.broadcast %393 : vector<1x1xf32> to vector<8x1xf32>
    %474 = arith.mulf %473, %472 : vector<8x1xf32>
    %475 = arith.mulf %474, %470 : vector<8x1xf32>
    %476 = arith.addf %358, %475 : vector<8x1xf32>
    %477 = arith.mulf %474, %441 : vector<8x1xf32>
    %478 = arith.addf %360, %477 : vector<8x1xf32>
    %479 = arith.mulf %441, %470 : vector<8x1xf32>
    %480 = arith.mulf %474, %479 : vector<8x1xf32>
    %481 = arith.addf %363, %480 : vector<8x1xf32>
    %482 = arith.mulf %441, %441 : vector<8x1xf32>
    %483 = arith.mulf %474, %482 : vector<8x1xf32>
    %484 = arith.addf %366, %483 : vector<8x1xf32>
    %485 = arith.addf %367, %474 : vector<8x1xf32>
    %486 = arith.addf %368, %393 : vector<1x1xf32>
    %487 = arith.subf %433, %372 : vector<8x32xf32>
    %488 = vector.broadcast %393 : vector<1x1xf32> to vector<8x32xf32>
    %489 = arith.mulf %488, %487 : vector<8x32xf32>
    %490 = arith.addf %372, %489 : vector<8x32xf32>
    %491 = arith.subf %431, %376 : vector<8x32xf32>
    %492 = vector.broadcast %393 : vector<1x1xf32> to vector<8x32xf32>
    %493 = arith.mulf %492, %491 : vector<8x32xf32>
    %494 = arith.addf %376, %493 : vector<8x32xf32>
    %495 = arith.subf %436, %380 : vector<8x128xf32>
    %496 = vector.broadcast %393 : vector<1x1xf32> to vector<8x128xf32>
    %497 = arith.mulf %496, %495 : vector<8x128xf32>
    %498 = arith.addf %380, %497 : vector<8x128xf32>
    %499 = arith.fptosi %393 : vector<1x1xf32> to vector<1x1xi32>
    %500 = arith.subi %454, %385 : vector<8x1xi32>
    %501 = vector.broadcast %499 : vector<1x1xi32> to vector<8x1xi32>
    %502 = arith.muli %501, %500 : vector<8x1xi32>
    %503 = arith.addi %385, %502 : vector<8x1xi32>
    %504 = arith.cmpi sge, %454, %2 : vector<8x1xi32>
    %505 = arith.extui %504 : vector<8x1xi1> to vector<8x1xi32>
    %506 = arith.sitofp %505 : vector<8x1xi32> to vector<8x1xf32>
    %cst_100 = arith.constant dense<0x7F800000> : vector<1xf32>
    %507 = vector.multi_reduction <minimumf>, %506, %cst_100 [0] : vector<8x1xf32> to vector<1xf32>
    %508 = vector.shape_cast %507 : vector<1xf32> to vector<1x1xf32>
    %cst_101 = arith.constant 1.000000e+00 : f32
    %509 = vector.broadcast %cst_101 : f32 to vector<1x1xf32>
    %510 = arith.subf %509, %508 : vector<1x1xf32>
    %511 = arith.mulf %393, %510 : vector<1x1xf32>
    %512 = arith.cmpi sge, %503, %2 : vector<8x1xi32>
    %513 = arith.extui %512 : vector<8x1xi1> to vector<8x1xi32>
    %514 = arith.sitofp %513 : vector<8x1xi32> to vector<8x1xf32>
    %c1_i32_102 = arith.constant 1 : i32
    %515 = vector.broadcast %c1_i32_102 : i32 to vector<8x1xi32>
    %516 = arith.subi %2, %515 : vector<8x1xi32>
    %517 = arith.select %512, %516, %503 : vector<8x1xi1>, vector<8x1xi32>
    %518 = vector.broadcast %511 : vector<1x1xf32> to vector<8x1xf32>
    %519 = arith.mulf %518, %514 : vector<8x1xf32>
    %cst_103 = arith.constant 1.000000e+00 : f32
    %520 = vector.broadcast %cst_103 : f32 to vector<8x1xf32>
    %521 = arith.subf %520, %409 : vector<8x1xf32>
    %522 = arith.mulf %519, %521 : vector<8x1xf32>
    %523 = arith.subf %490, %408 : vector<8x32xf32>
    %524 = vector.broadcast %522 : vector<8x1xf32> to vector<8x32xf32>
    %525 = arith.mulf %524, %523 : vector<8x32xf32>
    %526 = arith.addf %408, %525 : vector<8x32xf32>
    %527 = arith.addf %409, %522 : vector<8x1xf32>
    %528 = arith.addi %517, %22 : vector<8x1xi32>
    %529 = vector.broadcast %528 : vector<8x1xi32> to vector<8x128xi32>
    %530 = arith.cmpi eq, %19, %529 : vector<8x128xi32>
    %531 = arith.extui %530 : vector<8x128xi1> to vector<8x128xi32>
    %532 = arith.sitofp %531 : vector<8x128xi32> to vector<8x128xf32>
    %533 = arith.truncf %532 : vector<8x128xf32> to vector<8x128xbf16>
    %cst_104 = arith.constant dense<0.000000e+00> : vector<8x128xf32>
    %534 = tpu.matmul %533, %18, %cst_104 {dimension_numbers = #tpu.dot_dimension_numbers<[1], [0], [0], [1], [0, 0, 1, 1], [], []>} : vector<8x128xbf16>, vector<128x128xbf16>, vector<8x128xf32> -> vector<8x128xf32>
    %535 = arith.addf %534, %498 : vector<8x128xf32>
    %536 = vector.extract_strided_slice %535 {offsets = [0, 0], sizes = [8, 96], strides = [1, 1]} : vector<8x128xf32> to vector<8x96xf32>
    %537 = arith.negf %536 : vector<8x96xf32>
    %538 = math.exp %537 : vector<8x96xf32>
    %cst_105 = arith.constant 1.000000e+00 : f32
    %539 = vector.broadcast %cst_105 : f32 to vector<8x96xf32>
    %540 = arith.addf %539, %538 : vector<8x96xf32>
    %541 = arith.divf %539, %540 : vector<8x96xf32>
    %542 = vector.extract_strided_slice %541 {offsets = [0, 0], sizes = [8, 32], strides = [1, 1]} : vector<8x96xf32> to vector<8x32xf32>
    %543 = vector.extract_strided_slice %541 {offsets = [0, 32], sizes = [8, 32], strides = [1, 1]} : vector<8x96xf32> to vector<8x32xf32>
    %544 = vector.extract_strided_slice %541 {offsets = [0, 64], sizes = [8, 32], strides = [1, 1]} : vector<8x96xf32> to vector<8x32xf32>
    %545 = vector.extract_strided_slice %535 {offsets = [0, 96], sizes = [8, 32], strides = [1, 1]} : vector<8x128xf32> to vector<8x32xf32>
    %546 = math.tanh %545 : vector<8x32xf32>
    %547 = arith.mulf %543, %494 : vector<8x32xf32>
    %548 = arith.mulf %542, %546 : vector<8x32xf32>
    %549 = arith.addf %547, %548 : vector<8x32xf32>
    %550 = math.tanh %549 : vector<8x32xf32>
    %551 = arith.mulf %544, %550 : vector<8x32xf32>
    %552 = arith.truncf %551 : vector<8x32xf32> to vector<8x32xbf16>
    %cst_106 = arith.constant dense<0.000000e+00> : vector<8x133xf32>
    %553 = tpu.matmul %552, %8, %cst_106 {dimension_numbers = #tpu.dot_dimension_numbers<[1], [0], [0], [1], [0, 0, 1, 1], [], []>} : vector<8x32xbf16>, vector<32x133xbf16>, vector<8x133xf32> -> vector<8x133xf32>
    %554 = vector.extract_strided_slice %553 {offsets = [0, 128], sizes = [8, 5], strides = [1, 1]} : vector<8x133xf32> to vector<8x5xf32>
    %555 = vector.broadcast %9 : vector<1x5xf32> to vector<8x5xf32>
    %556 = arith.addf %554, %555 : vector<8x5xf32>
    %557 = vector.extract_strided_slice %556 {offsets = [0, 0], sizes = [8, 4], strides = [1, 1]} : vector<8x5xf32> to vector<8x4xf32>
    %558 = vector.extract_strided_slice %556 {offsets = [0, 4], sizes = [8, 1], strides = [1, 1]} : vector<8x5xf32> to vector<8x1xf32>
    %559 = vector.extract_strided_slice %4 {offsets = [32, 0], sizes = [8, 4], strides = [1, 1]} : vector<40x4xf32> to vector<8x4xf32>
    %560 = arith.addf %557, %559 : vector<8x4xf32>
    %cst_107 = arith.constant dense<0xFF800000> : vector<8xf32>
    %561 = vector.multi_reduction <maximumf>, %560, %cst_107 [1] : vector<8x4xf32> to vector<8xf32>
    %562 = vector.shape_cast %561 : vector<8xf32> to vector<8x1xf32>
    %563 = vector.broadcast %562 : vector<8x1xf32> to vector<8x4xf32>
    %564 = arith.cmpf oge, %560, %563 : vector<8x4xf32>
    %c4_i32_108 = arith.constant 4 : i32
    %565 = vector.broadcast %c4_i32_108 : i32 to vector<8x4xi32>
    %566 = arith.select %564, %23, %565 : vector<8x4xi1>, vector<8x4xi32>
    %cst_109 = arith.constant dense<2147483647> : vector<8xi32>
    %567 = vector.multi_reduction <minsi>, %566, %cst_109 [1] : vector<8x4xi32> to vector<8xi32>
    %568 = vector.shape_cast %567 : vector<8xi32> to vector<8x1xi32>
    %cst_110 = arith.constant dense<0xFF800000> : vector<8xf32>
    %569 = vector.multi_reduction <maximumf>, %557, %cst_110 [1] : vector<8x4xf32> to vector<8xf32>
    %570 = vector.shape_cast %569 : vector<8xf32> to vector<8x1xf32>
    %571 = vector.broadcast %570 : vector<8x1xf32> to vector<8x4xf32>
    %572 = arith.subf %557, %571 : vector<8x4xf32>
    %573 = math.exp %572 : vector<8x4xf32>
    %cst_111 = arith.constant dense<0.000000e+00> : vector<8xf32>
    %574 = vector.multi_reduction <add>, %573, %cst_111 [1] : vector<8x4xf32> to vector<8xf32>
    %575 = vector.shape_cast %574 : vector<8xf32> to vector<8x1xf32>
    %576 = math.log %575 : vector<8x1xf32>
    %577 = arith.addf %570, %576 : vector<8x1xf32>
    %578 = vector.broadcast %568 : vector<8x1xi32> to vector<8x4xi32>
    %579 = arith.cmpi eq, %23, %578 : vector<8x4xi32>
    %cst_112 = arith.constant 0.000000e+00 : f32
    %580 = vector.broadcast %cst_112 : f32 to vector<8x4xf32>
    %581 = arith.select %579, %557, %580 : vector<8x4xi1>, vector<8x4xf32>
    %cst_113 = arith.constant dense<0.000000e+00> : vector<8xf32>
    %582 = vector.multi_reduction <add>, %581, %cst_113 [1] : vector<8x4xf32> to vector<8xf32>
    %583 = vector.shape_cast %582 : vector<8xf32> to vector<8x1xf32>
    %584 = arith.subf %583, %577 : vector<8x1xf32>
    %cst_114 = arith.constant 1.000000e+00 : f32
    %585 = vector.broadcast %cst_114 : f32 to vector<8x1xf32>
    %586 = arith.subf %585, %514 : vector<8x1xf32>
    %587 = vector.broadcast %511 : vector<1x1xf32> to vector<8x1xf32>
    %588 = arith.mulf %587, %586 : vector<8x1xf32>
    %589 = arith.mulf %588, %584 : vector<8x1xf32>
    %590 = arith.addf %476, %589 : vector<8x1xf32>
    %591 = arith.mulf %588, %558 : vector<8x1xf32>
    %592 = arith.addf %478, %591 : vector<8x1xf32>
    %593 = arith.mulf %558, %584 : vector<8x1xf32>
    %594 = arith.mulf %588, %593 : vector<8x1xf32>
    %595 = arith.addf %481, %594 : vector<8x1xf32>
    %596 = arith.mulf %558, %558 : vector<8x1xf32>
    %597 = arith.mulf %588, %596 : vector<8x1xf32>
    %598 = arith.addf %484, %597 : vector<8x1xf32>
    %599 = arith.addf %485, %588 : vector<8x1xf32>
    %600 = arith.addf %486, %511 : vector<1x1xf32>
    %601 = arith.subf %551, %490 : vector<8x32xf32>
    %602 = vector.broadcast %511 : vector<1x1xf32> to vector<8x32xf32>
    %603 = arith.mulf %602, %601 : vector<8x32xf32>
    %604 = arith.addf %490, %603 : vector<8x32xf32>
    %cst_115 = arith.constant 5.000000e-01 : f32
    %605 = vector.broadcast %cst_115 : f32 to vector<8x1xf32>
    %606 = arith.cmpf ogt, %527, %605 : vector<8x1xf32>
    %607 = vector.shape_cast %606 : vector<8x1xi1> to vector<8x1xi1>
    %608 = vector.broadcast %607 : vector<8x1xi1> to vector<8x32xi1>
    %609 = arith.select %608, %526, %604 : vector<8x32xi1>, vector<8x32xf32>
    %610 = arith.truncf %609 : vector<8x32xf32> to vector<8x32xbf16>
    %611 = arith.mulf %1, %609 : vector<8x32xf32>
    %612 = arith.truncf %611 : vector<8x32xf32> to vector<8x32xbf16>
    %613 = vector.extract_strided_slice %10 {offsets = [32, 0], sizes = [32, 256], strides = [1, 1]} : vector<96x256xbf16> to vector<32x256xbf16>
    %cst_116 = arith.constant dense<0.000000e+00> : vector<8x256xf32>
    %614 = tpu.matmul %610, %613, %cst_116 {dimension_numbers = #tpu.dot_dimension_numbers<[1], [0], [0], [1], [0, 0, 1, 1], [], []>} : vector<8x32xbf16>, vector<32x256xbf16>, vector<8x256xf32> -> vector<8x256xf32>
    %615 = arith.addf %26, %614 : vector<8x256xf32>
    %616 = vector.extract_strided_slice %10 {offsets = [64, 0], sizes = [32, 256], strides = [1, 1]} : vector<96x256xbf16> to vector<32x256xbf16>
    %cst_117 = arith.constant dense<0.000000e+00> : vector<8x256xf32>
    %617 = tpu.matmul %612, %616, %cst_117 {dimension_numbers = #tpu.dot_dimension_numbers<[1], [0], [0], [1], [0, 0, 1, 1], [], []>} : vector<8x32xbf16>, vector<32x256xbf16>, vector<8x256xf32> -> vector<8x256xf32>
    %618 = arith.addf %615, %617 : vector<8x256xf32>
    %619 = vector.broadcast %11 : vector<1x256xf32> to vector<8x256xf32>
    %620 = arith.addf %618, %619 : vector<8x256xf32>
    %621 = arith.mulf %620, %5 : vector<8x256xf32>
    %cst_118 = arith.constant 0.000000e+00 : f32
    %622 = vector.broadcast %cst_118 : f32 to vector<8x256xf32>
    %623 = arith.cmpf oge, %621, %622 : vector<8x256xf32>
    %cst_119 = arith.constant 0.00999999977 : f32
    %624 = vector.broadcast %cst_119 : f32 to vector<8x256xf32>
    %625 = arith.mulf %624, %621 : vector<8x256xf32>
    %626 = arith.select %623, %621, %625 : vector<8x256xi1>, vector<8x256xf32>
    %627 = arith.truncf %626 : vector<8x256xf32> to vector<8x256xbf16>
    %cst_120 = arith.constant dense<0.000000e+00> : vector<8x1xf32>
    %628 = tpu.matmul %627, %12, %cst_120 {dimension_numbers = #tpu.dot_dimension_numbers<[1], [0], [0], [1], [0, 0, 1, 1], [], []>} : vector<8x256xbf16>, vector<256x1xbf16>, vector<8x1xf32> -> vector<8x1xf32>
    %629 = vector.broadcast %13 : vector<1x1xf32> to vector<8x1xf32>
    %630 = arith.addf %628, %629 : vector<8x1xf32>
    %631 = arith.negf %630 : vector<8x1xf32>
    %632 = math.exp %631 : vector<8x1xf32>
    %cst_121 = arith.constant 1.000000e+00 : f32
    %633 = vector.broadcast %cst_121 : f32 to vector<8x1xf32>
    %634 = arith.addf %633, %632 : vector<8x1xf32>
    %635 = arith.divf %633, %634 : vector<8x1xf32>
    %cst_122 = arith.constant 5.000000e-01 : f32
    %636 = vector.broadcast %cst_122 : f32 to vector<8x1xf32>
    %637 = arith.cmpf ogt, %635, %636 : vector<8x1xf32>
    %638 = arith.extui %637 : vector<8x1xi1> to vector<8x1xi32>
    %639 = arith.sitofp %638 : vector<8x1xi32> to vector<8x1xf32>
    %640 = arith.cmpf oeq, %639, %3 : vector<8x1xf32>
    %641 = arith.extui %640 : vector<8x1xi1> to vector<8x1xi32>
    %642 = arith.sitofp %641 : vector<8x1xi32> to vector<8x1xf32>
    %cst_123 = arith.constant 0.000000e+00 : f32
    %643 = vector.broadcast %cst_123 : f32 to vector<1x1xf32>
    %644 = arith.subf %643, %600 : vector<1x1xf32>
    %cst_124 = arith.constant 8.000000e+00 : f32
    %645 = vector.broadcast %cst_124 : f32 to vector<1x1xf32>
    %646 = arith.divf %644, %645 : vector<1x1xf32>
    %647 = vector.broadcast %646 : vector<1x1xf32> to vector<8x1xf32>
    %648 = arith.addf %647, %642 : vector<8x1xf32>
    %cst_125 = arith.constant 8.000000e+00 : f32
    %649 = vector.broadcast %cst_125 : f32 to vector<1x1xf32>
    %650 = arith.mulf %649, %600 : vector<1x1xf32>
    %651 = arith.mulf %648, %590 : vector<8x1xf32>
    %652 = arith.subf %651, %595 : vector<8x1xf32>
    %cst_126 = arith.constant dense<0.000000e+00> : vector<1xf32>
    %653 = vector.multi_reduction <add>, %652, %cst_126 [0] : vector<8x1xf32> to vector<1xf32>
    %654 = vector.shape_cast %653 : vector<1xf32> to vector<1x1xf32>
    %655 = arith.divf %654, %650 : vector<1x1xf32>
    %cst_127 = arith.constant 2.000000e+00 : f32
    %656 = vector.broadcast %cst_127 : f32 to vector<8x1xf32>
    %657 = arith.mulf %656, %648 : vector<8x1xf32>
    %658 = arith.mulf %657, %592 : vector<8x1xf32>
    %659 = arith.subf %598, %658 : vector<8x1xf32>
    %660 = arith.mulf %648, %648 : vector<8x1xf32>
    %661 = arith.mulf %660, %599 : vector<8x1xf32>
    %662 = arith.addf %659, %661 : vector<8x1xf32>
    %cst_128 = arith.constant dense<0.000000e+00> : vector<1xf32>
    %663 = vector.multi_reduction <add>, %662, %cst_128 [0] : vector<8x1xf32> to vector<1xf32>
    %664 = vector.shape_cast %663 : vector<1xf32> to vector<1x1xf32>
    %665 = arith.divf %664, %650 : vector<1x1xf32>
    %cst_129 = arith.constant 1.000000e-07 : f32
    %cst_130 = arith.constant 0.99999988 : f32
    %666 = vector.broadcast %cst_129 : f32 to vector<8x1xf32>
    %667 = arith.maximumf %666, %635 : vector<8x1xf32>
    %668 = vector.broadcast %cst_130 : f32 to vector<8x1xf32>
    %669 = arith.minimumf %668, %667 : vector<8x1xf32>
    %cst_131 = arith.constant 5.000000e-01 : f32
    %670 = vector.broadcast %cst_131 : f32 to vector<8x1xf32>
    %671 = arith.cmpf ogt, %3, %670 : vector<8x1xf32>
    %cst_132 = arith.constant 1.000000e+00 : f32
    %672 = vector.broadcast %cst_132 : f32 to vector<8x1xf32>
    %673 = arith.subf %672, %669 : vector<8x1xf32>
    %674 = arith.select %671, %669, %673 : vector<8x1xi1>, vector<8x1xf32>
    %675 = math.log %674 : vector<8x1xf32>
    %cst_133 = arith.constant 0.000000e+00 : f32
    %676 = vector.broadcast %cst_133 : f32 to vector<8x1xf32>
    %677 = arith.subf %676, %675 : vector<8x1xf32>
    %cst_134 = arith.constant 1.000000e+00 : f32
    %678 = vector.broadcast %cst_134 : f32 to vector<8x1xf32>
    %679 = arith.subf %678, %674 : vector<8x1xf32>
    %680 = arith.mulf %679, %679 : vector<8x1xf32>
    %681 = arith.mulf %680, %677 : vector<8x1xf32>
    %cst_135 = arith.constant dense<0.000000e+00> : vector<1xf32>
    %682 = vector.multi_reduction <add>, %681, %cst_135 [0] : vector<8x1xf32> to vector<1xf32>
    %683 = vector.shape_cast %682 : vector<1xf32> to vector<1x1xf32>
    %684 = arith.subf %683, %655 : vector<1x1xf32>
    %685 = arith.addf %684, %665 : vector<1x1xf32>
    %c0_136 = arith.constant 0 : index
    %c0_137 = arith.constant 0 : index
    %686 = vector.load %arg14[%c0_136, %c0_137] : memref<1x1xf32, #tpu.memory_space<vmem>>, vector<1x1xf32>
    tpu.vector_store %arg14[%c0_136, %c0_137], %685 {strides = array<i32>} : memref<1x1xf32, #tpu.memory_space<vmem>>, vector<1x1xf32>,
    return
  }
}

</mosaic_0001>

<bundles_post_ra>
// kernel: tpu_custom_call.1
= control target key start
LH: loop header
LB: loop body
LE: loop exit
PB: predicated region body
PF: predicated region fallthrough
CT: control target
= control target key end

     0   :  { %s3263_s0 = inlined_call_operand.vmem [shape: f32[128,32], index: 0, kind: input, shape index: {}]   ;;  %s3264_s1 = inlined_call_operand.vmem [shape: f32[8,32], index: 1, kind: input, shape index: {}]   ;;  %s3265_s2 = inlined_call_operand.vmem [shape: s32[8,1], index: 2, kind: input, shape index: {}]   ;;  %s3266_s3 = inlined_call_operand.vmem [shape: f32[8,1], index: 3, kind: input, shape index: {}]   ;;  %s3267_s4 = inlined_call_operand.vmem [shape: f32[40,4], index: 4, kind: input, shape index: {}]   ;;  %s3268_s5 = inlined_call_operand.vmem [shape: f32[8,256], index: 5, kind: input, shape index: {}]   ;;  %s3269_s6 = inlined_call_operand.vmem [shape: bf16[32,128], index: 6, kind: input, shape index: {}]   ;;  %s3270_s7 = inlined_call_operand.vmem [shape: f32[1,128], index: 7, kind: input, shape index: {}]   ;;  %s3271_s8 = inlined_call_operand.vmem [shape: bf16[32,133], index: 8, kind: input, shape index: {}]   ;;  %s3272_s9 = inlined_call_operand.vmem [shape: f32[1,5], index: 9, kind: input, shape index: {}]   ;;  %s3273_s10 = inlined_call_operand.vmem [shape: bf16[96,256], index: 10, kind: input, shape index: {}]   ;;  %s3274_s11 = inlined_call_operand.vmem [shape: f32[1,256], index: 11, kind: input, shape index: {}]   ;;  %s3275_s12 = inlined_call_operand.vmem [shape: bf16[256,1], index: 12, kind: input, shape index: {}]   ;;  %s3276_s13 = inlined_call_operand.<no memory space> [shape: f32[1,1], index: 13, kind: input, shape index: {}]   ;;  %s3277_s14 = inlined_call_operand.hbm [shape: f32[1,1], index: 14, kind: output, shape index: {}]  }
   0x1   :  { %v19_v0 = vstv %s3276_s13 }
   0x2   :  { %20 = vst [vmem:[#allocation2] sm:$0x1] %v19_v0 }
   0x3   :  { %v2196_v1 = vld [vmem:[%s3269_s6] sm:$0xff]   ;;  %v289_v2 = vlaneseq  ;;  %v2197_v3 = vld [vmem:[%s3269_s6 + $0x8] sm:$0xff]   ;;  %vm159_vm0 = vcmask 261120   ;;  %v2332_v6 = vmov 0   ;;  %v53_v8 = vld [vmem:[%s3263_s0 + $0x10] sm:$0xff] }
   0x4   :  { %2060 = vmatprep.subr.bf16.mxu1 %v2196_v1  ;;  %v51_v4 = vld [vmem:[%s3263_s0] sm:$0xff]  ;;  %v52_v5 = vld [vmem:[%s3263_s0 + $0x8] sm:$0xff]  ;;  %2194 = vset.pattern.permute.xlu0 %v2332_v6  ;;  %v54_v9 = vld [vmem:[%s3263_s0 + $0x18] sm:$0xff] }
   0x5   :  { %2061 = vmatpush3.bf16.msra.mxu1 %v2196_v1  ;;  %v133_v7 = vpack.c.bf16 %v52_v5, %v51_v4  ;;  %v2438_v10 = vshrl.u32 %v289_v2, 7  ;;  %439 = vmatprep.mubr.bf16.mxu0 %v2332_v6  ;;  %v55_v11 = vld [vmem:[%s3263_s0 + $0x20] sm:$0xff]  ;;  %v56_v12 = vld [vmem:[%s3263_s0 + $0x28] sm:$0xff]  ;;  %v134_v13 = vpack.c.bf16 %v54_v9, %v53_v8  ;;  %v57_v18 = vld [vmem:[%s3263_s0 + $0x30] sm:$0xff] }
   0x6   :  { %2062 = vmatprep.subr.bf16.mxu1 %v2197_v3  ;;  %2195 = vset.pattern.permute.xlu1 %v2332_v6  ;;  %v135_v14 = vpack.c.bf16 %v56_v12, %v55_v11  ;;  %v2452_v15 = vld [vmem:[%s3265_s2] sm:$0xff]  ;;  %v58_v19 = vld [vmem:[%s3263_s0 + $0x38] sm:$0xff]  ;;  %v60_v21 = vld [vmem:[%s3263_s0 + $0x48] sm:$0xff] }
   0x7   :  { %2064 = vmatprep.mubr.msk.bf16.mxu1 %vm159_vm0, %v133_v7  ;;  %v2455_v16 = vmul.u32 9, %v2438_v10  ;;  %vm295_vm1 = vcmp.le.s32.totalorder %v2452_v15, 0  ;;  %v2459_v17 = vadd.s32 4294967295, %v2452_v15  ;;  %v59_v20 = vld [vmem:[%s3263_s0 + $0x40] sm:$0xff]  ;;  %v136_v24 = vpack.c.bf16 %v58_v19, %v57_v18  ;;  %v61_v26 = vld [vmem:[%s3263_s0 + $0x50] sm:$0xff]  ;;  %v62_v27 = vld [vmem:[%s3263_s0 + $0x58] sm:$0xff] }
   0x8   :  { %v137_v25 = vpack.c.bf16 %v60_v21, %v59_v20  ;;  %v63_v28 = vld [vmem:[%s3263_s0 + $0x60] sm:$0xff]  ;;  %v64_v29 = vld [vmem:[%s3263_s0 + $0x68] sm:$0xff]  ;;  %v138_v30 = vpack.c.bf16 %v62_v27, %v61_v26 }
   0x9   :  { %2063 = vmatpush3.bf16.msra.mxu1 %v2197_v3  ;;  %v2477_v22 = vsel %vm295_vm1, %v2459_v17, 0  ;;  %v139_v31 = vpack.c.bf16 %v64_v29, %v63_v28 }
   0xa   :  { %v308_v23 = vadd.s32 %v2477_v22, %v2455_v16 }
   0xc   :  { %2065 = vmatmul.mubr.msk.bf16.vlgmr.msra.gmra.mrb[0].mxu1 %vm159_vm0, %v134_v13  ;;  %310 = vperm.xlu0 %2194, %v308_v23  }
   0xd   :  { %2068 = vmatprep.mubr.msk.bf16.mxu1 %vm159_vm0, %v135_v14 }
  0x14   :  { %2069 = vmatmul.mubr.msk.bf16.gmra.mrb[4].mxu1 %vm159_vm0, %v136_v24 }
  0x15   :  { %2072 = vmatprep.mubr.msk.bf16.mxu1 %vm159_vm0, %v137_v25 }
  0x16   :  { %21 = vsyncpa [#allocation4], 0  ;;  %v65_v32 = vld [vmem:[%s3263_s0 + $0x70] sm:$0xff]  ;;  %v66_v33 = vld [vmem:[%s3263_s0 + $0x78] sm:$0xff]  ;;  %v2333_v35 = vmov 0.0   ;;  %vm2334_vm2 = vmmov 0  }
  0x17   :  { %v140_v34 = vpack.c.bf16 %v66_v33, %v65_v32  ;;  %2080 = vmatprep.subr.bf16.mxu1 %v2333_v35  ;;  %v1898_v37 = vld [vmem:[%s3270_s7] ss:$0 sm:$0xff]  ;;  %v2535_v14 = vand.u32 127, %v289_v2  ;;  %v2335_v2 = vmov 1.0|1.0   ;;  %s2336_s0 = smov 32  }
  0x18   :  { %s2337_s24 = smov 64   ;;  %vm456_vm5 = vcmask 31744   ;;  %vm527_vm12 = vcmask 7168  }
  0x1c   :  { %2073 = vmatmul.mubr.msk.bf16.gmra.mrb[8].mxu1 %vm159_vm0, %v138_v30 }
  0x1d   :  { %2076 = vmatprep.mubr.msk.bf16.mxu1 %vm159_vm0, %v139_v31 }
  0x24   :  { %2077 = vmatmul.mubr.msk.bf16.gmra.mrb[12].mxu1 %vm159_vm0, %v140_v34 }
  0x25   :  { %2096 = vmatprep.mubr.msk.bf16.mxu1 %vm2334_vm2, %v2333_v35 }
  0x8b   :  { %v311_v20 = vpop.permute.xlu0 %310 }
  0x8c   :  { %vm312_vm3 = vcmp.eq.s32.totalorder %v2535_v14, %v311_v20 }
  0x8d   :  { %vm1912_vm4 = vmpackc.low %vm312_vm3, %vm312_vm3 }
  0xdf   :  { %v2066_v36 = vpop.f32.mrb[0].mxu1 }
  0xe0   :  { %v218_v38 = vpop.f32.mrb[1].mxu1  ;;  %v227_v40 = vadd.f32 %v2066_v36, %v1898_v37 }
  0xe1   :  { %v2067_v39 = vpop.f32.mrb[2].mxu1  ;;  %v219_v43 = vadd.f32 %v1898_v37, %v218_v38  ;;  %v2578_v38 = vld [vmem:[%s3271_s8] ss:$8 sps:$4 sm:$0xff]  }
  0xe2   :  { %v230_v41 = vadd.f32 %v2067_v39, %v1898_v37  ;;  %v221_v42 = vpop.f32.mrb[3].mxu1  ;;  %v2583_v39 = vld [vmem:[%s3271_s8 + $0x14] ss:$8 sps:$4 sm:$0xff]  }
  0xe3   :  { %v222_v44 = vadd.f32 %v1898_v37, %v221_v42 }
  0xe4   :  { %v2511_v45 = vpack.c.bf16 %v230_v41, %v227_v40  ;;  %v2591_v40 = vld [vmem:[%s3271_s8 + $0x10] ss:$8 sps:$4 sm:$0xff]  }
  0xe5   :  { %v2513_v46 = vpack.c.bf16 %v222_v44, %v219_v43 }
  0xe7   :  { %v2070_v47 = vpop.f32.mrb[4].mxu1  ;;  %2081 = vmatpush3.bf16.msra.mxu1 %v2513_v46 }
  0xe8   :  { %v234_v48 = vpop.f32.mrb[5].mxu1  ;;  %2082 = vmatprep.subr.bf16.mxu1 %v2333_v35  ;;  %v243_v50 = vadd.f32 %v2070_v47, %v1898_v37 }
  0xe9   :  { %v2071_v49 = vpop.f32.mrb[6].mxu1  ;;  %v235_v53 = vadd.f32 %v1898_v37, %v234_v48  ;;  %v2611_v48 = vld [vmem:[%s3272_s9] ss:$0 sm:$0xff] }
  0xea   :  { %v246_v51 = vadd.f32 %v2071_v49, %v1898_v37  ;;  %v237_v52 = vpop.f32.mrb[7].mxu1 }
  0xeb   :  { %v238_v54 = vadd.f32 %v1898_v37, %v237_v52  ;;  %2083 = vmatpush3.bf16.msra.mxu1 %v2511_v45 }
  0xec   :  { %v2518_v55 = vpack.c.bf16 %v246_v51, %v243_v50  ;;  %2084 = vmatprep.subr.bf16.mxu1 %v2333_v35  ;;  %v70_v51 = vld [vmem:[%s3267_s4] sm:$0xff] }
  0xed   :  { %v2521_v56 = vpack.c.bf16 %v238_v54, %v235_v53 }
  0xef   :  { %v2074_v57 = vpop.f32.mrb[8].mxu1  ;;  %2085 = vmatpush3.bf16.msra.mxu1 %v2521_v56 }
  0xf0   :  { %v250_v58 = vpop.f32.mrb[9].mxu1  ;;  %2086 = vmatprep.subr.bf16.mxu1 %v2333_v35  ;;  %v259_v60 = vadd.f32 %v2074_v57, %v1898_v37 }
  0xf1   :  { %v2075_v59 = vpop.f32.mrb[10].mxu1  ;;  %v251_v63 = vadd.f32 %v1898_v37, %v250_v58 }
  0xf2   :  { %v262_v61 = vadd.f32 %v2075_v59, %v1898_v37  ;;  %v253_v62 = vpop.f32.mrb[11].mxu1 }
  0xf3   :  { %v254_v0 = vadd.f32 %v1898_v37, %v253_v62  ;;  %2087 = vmatpush3.bf16.msra.mxu1 %v2518_v55 }
  0xf4   :  { %v2526_v1 = vpack.c.bf16 %v262_v61, %v259_v60  ;;  %2088 = vmatprep.subr.bf16.mxu1 %v2333_v35 }
  0xf5   :  { %v2529_v3 = vpack.c.bf16 %v254_v0, %v251_v63 }
  0xf7   :  { %v2078_v4 = vpop.f32.mrb[12].mxu1  ;;  %2089 = vmatpush3.bf16.msra.mxu1 %v2529_v3 }
  0xf8   :  { %v266_v5 = vpop.f32.mrb[13].mxu1  ;;  %2090 = vmatprep.subr.bf16.mxu1 %v2333_v35  ;;  %v275_v8 = vadd.f32 %v2078_v4, %v1898_v37 }
  0xf9   :  { %v2079_v7 = vpop.f32.mrb[14].mxu1  ;;  %v267_v12 = vadd.f32 %v1898_v37, %v266_v5 }
  0xfa   :  { %v278_v9 = vadd.f32 %v2079_v7, %v1898_v37  ;;  %v269_v11 = vpop.f32.mrb[15].mxu1 }
  0xfb   :  { %v270_v13 = vadd.f32 %v1898_v37, %v269_v11  ;;  %2091 = vmatpush3.bf16.msra.mxu1 %v2526_v1  ;;  %v2573_v37 = vld [vmem:[%s3271_s8 + $0x4] ss:$8 sps:$4 sm:$0xff]   ;;  %v477_v11 = vadd.s32 1, %v2477_v22 }
  0xfc   :  { %v2537_v18 = vpack.c.bf16 %v278_v9, %v275_v8  ;;  %2092 = vmatprep.subr.bf16.mxu1 %v2333_v35  ;;  %407 = vmatprep.subr.bf16.mxu0 %v2573_v37 }
  0xfd   :  { %v2540_v19 = vpack.c.bf16 %v270_v13, %v267_v12  ;;  %408 = vmatpush1.bf16.msra.mxu0 %v2578_v38 }
  0xfe   :  { %409 = vmatprep.subr.bf16.mxu0 %v2583_v39 }
  0xff   :  { %2093 = vmatpush3.bf16.msra.mxu1 %v2540_v19 }
 0x100   :  { %2094 = vmatprep.subr.bf16.mxu1 %v2333_v35 }
 0x101   :  { %410 = vmatpush1.bf16.msra.mxu0 %v2591_v40 }
 0x102   :  { %628 = vmatprep.subr.bf16.mxu0 %v2573_v37 }
 0x103   :  { %2095 = vmatpush3.bf16.msra.mxu1 %v2537_v18 }
 0x104   :  { %2100 = vmatprep.subr.bf16.mxu1 %v2333_v35 }
 0x106   :  { %2097 = vmatmul.mubr.msk.bf16.vlgmr.msra.gmra.mrb[16].mxu1 %vm1912_vm4, %v2335_v2 }
 0x107   :  { %2101 = vmatpush3.bf16.msra.mxu1 %v2513_v46  ;;  %2116 = vmatprep.mubr.msk.bf16.mxu1 %vm2334_vm2, %v2333_v35 }
 0x108   :  { %2102 = vmatprep.subr.bf16.mxu1 %v2333_v35 }
 0x10b   :  { %2103 = vmatpush3.bf16.msra.mxu1 %v2511_v45 }
 0x10c   :  { %2104 = vmatprep.subr.bf16.mxu1 %v2333_v35 }
 0x10f   :  { %2105 = vmatpush3.bf16.msra.mxu1 %v2521_v56 }
 0x110   :  { %2106 = vmatprep.subr.bf16.mxu1 %v2333_v35 }
 0x113   :  { %2107 = vmatpush3.bf16.msra.mxu1 %v2518_v55 }
 0x114   :  { %2108 = vmatprep.subr.bf16.mxu1 %v2333_v35 }
 0x117   :  { %2109 = vmatpush3.bf16.msra.mxu1 %v2529_v3 }
 0x118   :  { %2110 = vmatprep.subr.bf16.mxu1 %v2333_v35 }
 0x11b   :  { %2111 = vmatpush3.bf16.msra.mxu1 %v2526_v1 }
 0x11c   :  { %2112 = vmatprep.subr.bf16.mxu1 %v2333_v35 }
 0x11f   :  { %2113 = vmatpush3.bf16.msra.mxu1 %v2540_v19 }
 0x120   :  { %2114 = vmatprep.subr.bf16.mxu1 %v2333_v35 }
 0x123   :  { %2115 = vmatpush3.bf16.msra.mxu1 %v2537_v18 }
 0x124   :  { %862 = vmatprep.subr.bf16.mxu1 %v2573_v37 }
 0x1d9   :  { %v350_v21 = vpop.f32.mrb[16].mxu1 }
 0x1da   :  { %2238 = vtanh.f32 %v350_v21  ;;  %v2098_v23 = vpop.f32.mrb[17].mxu1  ;;  %v1914_v27 = vmul.f32 -1.442695, %v350_v21 }
 0x1db   :  { %v353_v24 = vpop.f32.mrb[18].mxu1 }
 0x1dc   :  { %v2099_v25 = vpop.f32.mrb[19].mxu1  ;;  %2240 = vpow2.f32 %v1914_v27 }
 0x1e4   :  { %v2239_v26 = vpop.eup %2238 }
 0x1e5   :  { %365 = vrot.lane.b32.xlu0 %v2239_v26, %s2336_s0 }
 0x1e6   :  { %v2241_v28 = vpop.eup %2240 }
 0x1e7   :  { %v359_v29 = vadd.f32 1.0, %v2241_v28 }
 0x1e9   :  { %2242 = vrcp.f32 %v359_v29 }
 0x1f3   :  { %v2243_v30 = vpop.eup %2242 }
 0x1f4   :  { %v363_v33 = vmul.f32 0.0, %v2243_v30 }
 0x257   :  { %v366_v31 = vpop.permute.xlu0 %365 }
 0x258   :  { %v368_v32 = vmul.f32 %v2243_v30, %v366_v31 }
 0x25a   :  { %370 = vrot.lane.b32.xlu1 %v368_v32, %s2336_s0 }
 0x2cc   :  { %v371_v34 = vpop.permute.xlu1 %370 }
 0x2cd   :  { %v2567_v36 = vadd.f32 %v371_v34, %v363_v33 }
 0x2cf   :  { %2244 = vtanh.f32 %v2567_v36 }
 0x2d9   :  { %v2245_v41 = vpop.eup %2244 }
 0x2da   :  { %376 = vrot.lane.b32.xlu1 %v2245_v41, %s2336_s0 }
 0x34c   :  { %v377_v42 = vpop.permute.xlu1 %376 }
 0x34d   :  { %v2597_v43 = vmul.f32 %v2243_v30, %v377_v42 }
 0x34f   :  { %v380_v44 = vpack.c.bf16 %v2597_v43, %v2597_v43 }
 0x351   :  { %382 = vrot.lane.b32.xlu0 %v380_v44, %s2337_s24 }
 0x3c3   :  { %v383_v47 = vpop.permute.xlu0 %382 }
 0x3c4   :  { %1919 = vmatmul.mubr.msk.bf16.vlgmr.msra.gmra.mrb[0].mxu0 %vm159_vm0, %v383_v47 }
 0x3c5   :  { %629 = vmatpush1.bf16.msra.mxu0 %v2578_v38  ;;  %660 = vmatprep.mubr.bf16.mxu0 %v2332_v6 }
 0x3c6   :  { %630 = vmatprep.subr.bf16.mxu0 %v2583_v39 }
 0x3c9   :  { %631 = vmatpush1.bf16.msra.mxu0 %v2591_v40 }
 0x3ca   :  { %2120 = vmatprep.subr.bf16.mxu0 %v2333_v35 }
 0x497   :  { %v2613_v49 = vpop.f32.mrb[0].mxu0 }
 0x498   :  { %v443_v50 = vpop.f32.mrb[1].mxu0 }
 0x499   :  { %v2619_v52 = vadd.f32 %v2611_v48, %v443_v50  ;;  %v445_v53 = vpop.f32.mrb[2].mxu0 }
 0x49a   :  { %v446_v54 = vpop.f32.mrb[3].mxu0 }
 0x49b   :  { %v455_v57 = vadd.f32 %v2619_v52, %v70_v51 }
 0x49d   :  { %v457_v58 = vsel %vm456_vm5, %v455_v57, -inf }
 0x49e   :  { %458 = vmax.xlane.f32.xlu1 %v457_v58 }
 0x52b   :  { %v459_v59 = vpop.xlane.xlu1 %458 }
 0x52c   :  { %vm460_vm6 = vcmp.ge.f32.partialorder %v455_v57, %v459_v59 }
 0x52d   :  { %v461_v60 = vsel %vm460_vm6, %v2535_v14, 4 }
 0x52e   :  { %v462_v61 = vsel %vm456_vm5, %v461_v60, 2147483647 }
 0x52f   :  { %v464_v62 = vshra.s32 %v462_v61, 16  ;;  %v463_v0 = vand.u32 65535, %v462_v61 }
 0x531   :  { %v466_v63 = vcvt.s32.f32 %v464_v62  ;;  %v465_v5 = vcvt.s32.f32 %v463_v0  ;;  %v71_v62 = vld [vmem:[%s3267_s4 + $0x8] sm:$0xff] }
 0x533   :  { %467 = vmin.xlane.f32.xlu0 %v466_v63 }
 0x5c0   :  { %v468_v4 = vpop.xlane.xlu0 %467 }
 0x5c1   :  { %vm469_vm7 = vcmp.eq.f32.partialorder %v466_v63, %v468_v4  ;;  %v474_v8 = vcvt.f32.s32 %v468_v4 }
 0x5c2   :  { %v470_v7 = vsel %vm469_vm7, %v465_v5, inf }
 0x5c3   :  { %471 = vmin.xlane.f32.xlu0 %v470_v7  ;;  %v475_v12 = vshll.u32 %v474_v8, 16 }
 0x650   :  { %v472_v9 = vpop.xlane.xlu0 %471 }
 0x651   :  { %v473_v13 = vcvt.f32.s32 %v472_v9 }
 0x653   :  { %v2626_v20 = vadd.s32 %v475_v12, %v473_v13 }
 0x655   :  { %v2629_v21 = vadd.s32 %v477_v11, %v2626_v20 }
 0x657   :  { %vm524_vm8 = vcmp.ge.s32.totalorder %v2629_v21, %v2452_v15 }
 0x658   :  { %v2638_v23 = vsel %vm524_vm8, %v2459_v17, %v2629_v21 }
 0x659   :  { %v549_v22 = vadd.s32 %v2638_v23, %v2455_v16 }
 0x65b   :  { %551 = vperm.xlu1 %2195, %v549_v22   ;;  %v1921_v22 = vsel %vm524_vm8, 1.0, %v2333_v35 }
 0x6da   :  { %v552_v24 = vpop.permute.xlu1 %551 }
 0x6db   :  { %vm553_vm9 = vcmp.eq.s32.totalorder %v2535_v14, %v552_v24  ;;  %v528_v24 = vsel %vm527_vm12, %v1921_v22, inf }
 0x6dc   :  { %vm1923_vm10 = vmpackc.low %vm553_vm9, %vm553_vm9 }
 0x6dd   :  { %2117 = vmatmul.mubr.msk.bf16.vlgmr.msra.gmra.mrb[20].mxu1 %vm1923_vm10, %v2335_v2 }
 0x6de   :  { %863 = vmatpush1.bf16.msra.mxu1 %v2578_v38  ;;  %894 = vmatprep.mubr.bf16.mxu1 %v2332_v6 }
 0x6df   :  { %864 = vmatprep.subr.bf16.mxu1 %v2583_v39 }
 0x6e2   :  { %865 = vmatpush1.bf16.msra.mxu1 %v2591_v40 }
 0x6e3   :  { %2140 = vmatprep.subr.bf16.mxu1 %v2333_v35 }
 0x7b0   :  { %v591_v25 = vpop.f32.mrb[20].mxu1 }
 0x7b1   :  { %v592_v26 = vadd.f32 %v591_v25, %v2613_v49  ;;  %v2118_v27 = vpop.f32.mrb[21].mxu1 }
 0x7b2   :  { %v594_v28 = vpop.f32.mrb[22].mxu1 }
 0x7b3   :  { %2246 = vtanh.f32 %v592_v26  ;;  %v2119_v29 = vpop.f32.mrb[23].mxu1  ;;  %v1925_v31 = vmul.f32 -1.442695, %v592_v26  ;;  %v529_v26 = vrot.slane %v528_v24, 4 }
 0x7b5   :  { %2248 = vpow2.f32 %v1925_v31 }
 0x7bd   :  { %v2247_v30 = vpop.eup %2246 }
 0x7be   :  { %606 = vrot.lane.b32.xlu0 %v2247_v30, %s2336_s0  ;;  %v530_v30 = vmin.f32 %v528_v24, %v529_v26 }
 0x7bf   :  { %v2249_v32 = vpop.eup %2248 }
 0x7c0   :  { %v600_v33 = vadd.f32 1.0, %v2249_v32  ;;  %v531_v31 = vrot.slane %v530_v30, 2 }
 0x7c2   :  { %2250 = vrcp.f32 %v600_v33  ;;  %v532_v32 = vmin.f32 %v530_v30, %v531_v31 }
 0x7c4   :  { %v533_v33 = vrot.slane %v532_v32, 1 }
 0x7cc   :  { %v2251_v34 = vpop.eup %2250 }
 0x7cd   :  { %v604_v44 = vmul.f32 %v2251_v34, %v2567_v36 }
 0x830   :  { %v607_v41 = vpop.permute.xlu0 %606 }
 0x831   :  { %v609_v42 = vmul.f32 %v2251_v34, %v607_v41 }
 0x833   :  { %611 = vrot.lane.b32.xlu1 %v609_v42, %s2336_s0 }
 0x8a5   :  { %v612_v47 = vpop.permute.xlu1 %611 }
 0x8a6   :  { %v2653_v50 = vadd.f32 %v612_v47, %v604_v44 }
 0x8a8   :  { %2252 = vtanh.f32 %v2653_v50 }
 0x8b2   :  { %v2253_v51 = vpop.eup %2252 }
 0x8b3   :  { %617 = vrot.lane.b32.xlu1 %v2253_v51, %s2336_s0 }
 0x925   :  { %v618_v53 = vpop.permute.xlu1 %617 }
 0x926   :  { %v2657_v54 = vmul.f32 %v2251_v34, %v618_v53  ;;  %v534_v34 = vmin.f32 %v532_v32, %v533_v33  ;;  %v691_v53 = vadd.s32 1, %v2638_v23 }
 0x928   :  { %v621_v57 = vpack.c.bf16 %v2657_v54, %v2657_v54  ;;  %v2697_v41 = vsub.f32 1.0, %v534_v34 }
 0x92a   :  { %623 = vrot.lane.b32.xlu0 %v621_v57, %s2337_s24  ;;  %v2180_v57 = vtrunc.f32 %v2697_v41 }
 0x99c   :  { %v624_v58 = vpop.permute.xlu0 %623 }
 0x99d   :  { %1926 = vmatmul.mubr.msk.bf16.vlgmr.msra.gmra.mrb[4].mxu0 %vm159_vm0, %v624_v58 }
 0x99e   :  { %2121 = vmatpush3.bf16.msra.mxu0 %v2513_v46  ;;  %2136 = vmatprep.mubr.msk.bf16.mxu0 %vm2334_vm2, %v2333_v35 }
 0x99f   :  { %2122 = vmatprep.subr.bf16.mxu0 %v2333_v35 }
 0x9a2   :  { %2123 = vmatpush3.bf16.msra.mxu0 %v2511_v45 }
 0x9a3   :  { %2124 = vmatprep.subr.bf16.mxu0 %v2333_v35 }
 0x9a6   :  { %2125 = vmatpush3.bf16.msra.mxu0 %v2521_v56 }
 0x9a7   :  { %2126 = vmatprep.subr.bf16.mxu0 %v2333_v35 }
 0x9aa   :  { %2127 = vmatpush3.bf16.msra.mxu0 %v2518_v55 }
 0x9ab   :  { %2128 = vmatprep.subr.bf16.mxu0 %v2333_v35 }
 0x9ae   :  { %2129 = vmatpush3.bf16.msra.mxu0 %v2529_v3 }
 0x9af   :  { %2130 = vmatprep.subr.bf16.mxu0 %v2333_v35 }
 0x9b2   :  { %2131 = vmatpush3.bf16.msra.mxu0 %v2526_v1 }
 0x9b3   :  { %2132 = vmatprep.subr.bf16.mxu0 %v2333_v35 }
 0x9b6   :  { %2133 = vmatpush3.bf16.msra.mxu0 %v2540_v19 }
 0x9b7   :  { %2134 = vmatprep.subr.bf16.mxu0 %v2333_v35 }
 0x9ba   :  { %2135 = vmatpush3.bf16.msra.mxu0 %v2537_v18 }
 0x9bb   :  { %1096 = vmatprep.subr.bf16.mxu0 %v2573_v37 }
 0xa70   :  { %v662_v59 = vpop.f32.mrb[4].mxu0 }
 0xa71   :  { %v748_v60 = vsub.f32 %v662_v59, %v2613_v49  ;;  %v664_v61 = vpop.f32.mrb[5].mxu0 }
 0xa72   :  { %v2686_v63 = vadd.f32 %v2611_v48, %v664_v61  ;;  %v666_v0 = vpop.f32.mrb[6].mxu0  ;;  %v2181_v61 = vcvt.f32.s32 %v2180_v57 }
 0xa73   :  { %v667_v4 = vpop.f32.mrb[7].mxu0 }
 0xa74   :  { %v670_v5 = vadd.f32 %v2686_v63, %v71_v62 }
 0xa76   :  { %v671_v7 = vsel %vm456_vm5, %v670_v5, -inf }
 0xa77   :  { %672 = vmax.xlane.f32.xlu1 %v671_v7 }
 0xb04   :  { %v673_v8 = vpop.xlane.xlu1 %672 }
 0xb05   :  { %vm674_vm11 = vcmp.ge.f32.partialorder %v670_v5, %v673_v8 }
 0xb06   :  { %v675_v9 = vsel %vm674_vm11, %v2535_v14, 4 }
 0xb07   :  { %v676_v11 = vsel %vm456_vm5, %v675_v9, 2147483647 }
 0xb08   :  { %v678_v12 = vshra.s32 %v676_v11, 16  ;;  %v677_v25 = vand.u32 65535, %v676_v11  ;;  %v2718_v11 = vsel %vm295_vm1, 1.0, %v2333_v35 }
 0xb0a   :  { %v680_v13 = vcvt.s32.f32 %v678_v12  ;;  %v679_v28 = vcvt.s32.f32 %v677_v25 }
 0xb0c   :  { %681 = vmin.xlane.f32.xlu0 %v680_v13 }
 0xb99   :  { %v682_v27 = vpop.xlane.xlu0 %681 }
 0xb9a   :  { %vm683_vm13 = vcmp.eq.f32.partialorder %v680_v13, %v682_v27  ;;  %v688_v42 = vcvt.f32.s32 %v682_v27 }
 0xb9b   :  { %v684_v29 = vsel %vm683_vm13, %v679_v28, inf }
 0xb9c   :  { %685 = vmin.xlane.f32.xlu0 %v684_v29  ;;  %v689_v47 = vshll.u32 %v688_v42, 16  ;;  %v711_v29 = vsub.f32 1.0, %v1921_v22 }
 0xb9e   :  { %v2740_v32 = vmul.f32 %v711_v29, %v2697_v41  ;;  %v745_v29 = vsub.f32 %v2653_v50, %v2567_v36 }
 0xbb2   :  { %740 = vperm.xlu0 %2194, %v2697_v41  }
 0xc29   :  { %v686_v44 = vpop.xlane.xlu0 %685 }
 0xc2a   :  { %v687_v51 = vcvt.f32.s32 %v686_v44 }
 0xc2c   :  { %v2702_v58 = vadd.s32 %v689_v47, %v687_v51 }
 0xc2e   :  { %v692_v59 = vadd.s32 %v691_v53, %v2702_v58 }
 0xc30   :  { %v752_v62 = vsub.s32 %v692_v59, %v2629_v21  ;;  %vm755_vm14 = vcmp.ge.s32.totalorder %v692_v59, %v2452_v15 }
 0xc31   :  { %v1927_v0 = vsel %vm755_vm14, 1.0, %v2333_v35  ;;  %v2708_v4 = vpop.permute.xlu0 %740 }
 0xc32   :  { %v753_v5 = vmul.u32 %v2181_v61, %v752_v62  ;;  %v758_v7 = vsel %vm527_vm12, %v1927_v0, inf  ;;  %v749_v23 = vmul.f32 %v748_v60, %v2708_v4  ;;  %v537_v60 = vmul.f32 %v1921_v22, %v2697_v41 }
 0xc33   :  { %v759_v8 = vrot.slane %v758_v7, 4 }
 0xc34   :  { %v2713_v9 = vadd.s32 %v753_v5, %v2629_v21  ;;  %v2721_v13 = vadd.f32 %v749_v23, %v2613_v49  ;;  %v2730_v21 = vsub.f32 1.0, %v2718_v11 }
 0xc35   :  { %v760_v12 = vmin.f32 %v758_v7, %v759_v8 }
 0xc36   :  { %vm767_vm15 = vcmp.ge.s32.totalorder %v2713_v9, %v2452_v15  ;;  %v2736_v28 = vmul.f32 %v537_v60, %v2730_v21  ;;  %v735_v53 = vadd.f32 %v2740_v32, %v2730_v21 }
 0xc37   :  { %v761_v24 = vrot.slane %v760_v12, 2  ;;  %v2727_v25 = vsel %vm767_vm15, %v2459_v17, %v2713_v9  ;;  %v1928_v31 = vsel %vm767_vm15, 1.0, %v2333_v35 }
 0xc38   :  { %v783_v26 = vadd.s32 %v2727_v25, %v2455_v16  ;;  %v2744_v34 = vadd.f32 %v2718_v11, %v2736_v28  ;;  %v945_v44 = vsub.f32 1.0, %v1928_v31 }
 0xc39   :  { %v762_v27 = vmin.f32 %v760_v12, %v761_v24 }
 0xc3a   :  { %785 = vperm.xlu1 %2195, %v783_v26   ;;  %v772_v22 = vsub.f32 1.0, %v2744_v34 }
 0xc3b   :  { %v763_v49 = vrot.slane %v762_v27, 1 }
 0xc3d   :  { %v764_v30 = vmin.f32 %v762_v27, %v763_v49 }
 0xc3f   :  { %v765_v33 = vsub.f32 1.0, %v764_v30  ;;  %v746_v30 = vmul.f32 %v745_v29, %v2708_v4 }
 0xc41   :  { %v2747_v42 = vmul.f32 %v765_v33, %v2697_v41 }
 0xc43   :  { %v771_v47 = vmul.f32 %v1928_v31, %v2747_v42  ;;  %v2751_v51 = vmul.f32 %v945_v44, %v2747_v42  ;;  %v2775_v31 = vadd.f32 %v746_v30, %v2567_v36 }
 0xc45   :  { %v2756_v57 = vmul.f32 %v772_v22, %v771_v47  ;;  %v2759_v59 = vadd.f32 %v2751_v51, %v735_v53  ;;  %v737_v53 = vsub.f32 %v2657_v54, %v2597_v43 }
 0xc47   :  { %v743_v50 = vmul.f32 %v2708_v4, %v737_v53 }
 0xcb9   :  { %v786_v61 = vpop.permute.xlu1 %785 }
 0xcba   :  { %vm787_vm1 = vcmp.eq.s32.totalorder %v2535_v14, %v786_v61 }
 0xcbb   :  { %vm1930_vm3 = vmpackc.low %vm787_vm1, %vm787_vm1 }
 0xcbc   :  { %2137 = vmatmul.mubr.msk.bf16.vlgmr.msra.gmra.mrb[8].mxu0 %vm1930_vm3, %v2335_v2 }
 0xcbd   :  { %1097 = vmatpush1.bf16.msra.mxu0 %v2578_v38  ;;  %1128 = vmatprep.mubr.bf16.mxu0 %v2332_v6 }
 0xcbe   :  { %1098 = vmatprep.subr.bf16.mxu0 %v2583_v39 }
 0xcc1   :  { %1099 = vmatpush1.bf16.msra.mxu0 %v2591_v40 }
 0xcc2   :  { %2160 = vmatprep.subr.bf16.mxu0 %v2333_v35 }
 0xd8f   :  { %v825_v62 = vpop.f32.mrb[8].mxu0 }
 0xd90   :  { %v826_v0 = vadd.f32 %v825_v62, %v2721_v13  ;;  %v2138_v5 = vpop.f32.mrb[9].mxu0  ;;  %v2786_v62 = vadd.f32 %v743_v50, %v2597_v43 }
 0xd91   :  { %v828_v7 = vpop.f32.mrb[10].mxu0 }
 0xd92   :  { %2254 = vtanh.f32 %v826_v0  ;;  %v2139_v8 = vpop.f32.mrb[11].mxu0  ;;  %v1932_v12 = vmul.f32 -1.442695, %v826_v0 }
 0xd93   :  { %v72_v8 = vld [vmem:[%s3267_s4 + $0x10] sm:$0xff] }
 0xd94   :  { %2256 = vpow2.f32 %v1932_v12 }
 0xd9c   :  { %v2255_v23 = vpop.eup %2254 }
 0xd9d   :  { %840 = vrot.lane.b32.xlu1 %v2255_v23, %s2336_s0 }
 0xd9e   :  { %v2257_v24 = vpop.eup %2256 }
 0xd9f   :  { %v834_v60 = vadd.f32 1.0, %v2257_v24 }
 0xda1   :  { %2258 = vrcp.f32 %v834_v60 }
 0xdab   :  { %v2259_v26 = vpop.eup %2258 }
 0xdac   :  { %v838_v33 = vmul.f32 %v2259_v26, %v2775_v31 }
 0xe0f   :  { %v841_v27 = vpop.permute.xlu1 %840 }
 0xe10   :  { %v843_v49 = vmul.f32 %v2259_v26, %v841_v27 }
 0xe12   :  { %845 = vrot.lane.b32.xlu1 %v843_v49, %s2336_s0 }
 0xe84   :  { %v846_v44 = vpop.permute.xlu1 %845 }
 0xe85   :  { %v2778_v47 = vadd.f32 %v846_v44, %v838_v33 }
 0xe87   :  { %2260 = vtanh.f32 %v2778_v47 }
 0xe91   :  { %v2261_v22 = vpop.eup %2260 }
 0xe92   :  { %851 = vrot.lane.b32.xlu0 %v2261_v22, %s2336_s0 }
 0xf04   :  { %v852_v61 = vpop.permute.xlu0 %851 }
 0xf05   :  { %v854_v36 = vmul.f32 %v2259_v26, %v852_v61 }
 0xf07   :  { %v855_v0 = vpack.c.bf16 %v854_v36, %v854_v36  ;;  %v971_v5 = vsub.f32 %v854_v36, %v2786_v62 }
 0xf09   :  { %857 = vrot.lane.b32.xlu1 %v855_v0, %s2337_s24 }
 0xf7b   :  { %v858_v7 = vpop.permute.xlu1 %857 }
 0xf7c   :  { %1933 = vmatmul.mubr.msk.bf16.vlgmr.msra.gmra.mrb[24].mxu1 %vm159_vm0, %v858_v7 }
 0xf7d   :  { %2141 = vmatpush3.bf16.msra.mxu1 %v2513_v46  ;;  %2156 = vmatprep.mubr.msk.bf16.mxu1 %vm2334_vm2, %v2333_v35 }
 0xf7e   :  { %2142 = vmatprep.subr.bf16.mxu1 %v2333_v35 }
 0xf81   :  { %2143 = vmatpush3.bf16.msra.mxu1 %v2511_v45 }
 0xf82   :  { %2144 = vmatprep.subr.bf16.mxu1 %v2333_v35 }
 0xf85   :  { %2145 = vmatpush3.bf16.msra.mxu1 %v2521_v56 }
 0xf86   :  { %2146 = vmatprep.subr.bf16.mxu1 %v2333_v35 }
 0xf89   :  { %2147 = vmatpush3.bf16.msra.mxu1 %v2518_v55 }
 0xf8a   :  { %2148 = vmatprep.subr.bf16.mxu1 %v2333_v35 }
 0xf8d   :  { %2149 = vmatpush3.bf16.msra.mxu1 %v2529_v3 }
 0xf8e   :  { %2150 = vmatprep.subr.bf16.mxu1 %v2333_v35 }
 0xf91   :  { %2151 = vmatpush3.bf16.msra.mxu1 %v2526_v1 }
 0xf92   :  { %2152 = vmatprep.subr.bf16.mxu1 %v2333_v35 }
 0xf95   :  { %2153 = vmatpush3.bf16.msra.mxu1 %v2540_v19 }
 0xf96   :  { %2154 = vmatprep.subr.bf16.mxu1 %v2333_v35 }
 0xf99   :  { %2155 = vmatpush3.bf16.msra.mxu1 %v2537_v18 }
 0xf9a   :  { %1330 = vmatprep.subr.bf16.mxu1 %v2573_v37 }
0x104f   :  { %v2809_v54 = vpop.f32.mrb[24].mxu1 }
0x1050   :  { %v898_v4 = vpop.f32.mrb[25].mxu1 }
0x1051   :  { %v2815_v23 = vadd.f32 %v2611_v48, %v898_v4  ;;  %v900_v12 = vpop.f32.mrb[26].mxu1 }
0x1052   :  { %v901_v24 = vpop.f32.mrb[27].mxu1  ;;  %v925_v12 = vadd.s32 1, %v2727_v25 }
0x1053   :  { %v904_v60 = vadd.f32 %v2815_v23, %v72_v8  ;;  %v2182_v24 = vtrunc.f32 %v2747_v42 }
0x1055   :  { %v905_v26 = vsel %vm456_vm5, %v904_v60, -inf }
0x1056   :  { %906 = vmax.xlane.f32.xlu0 %v905_v26 }
0x10e3   :  { %v907_v27 = vpop.xlane.xlu0 %906 }
0x10e4   :  { %vm908_vm4 = vcmp.ge.f32.partialorder %v904_v60, %v907_v27  ;;  %v2183_v27 = vcvt.f32.s32 %v2182_v24 }
0x10e5   :  { %v909_v37 = vsel %vm908_vm4, %v2535_v14, 4 }
0x10e6   :  { %v910_v49 = vsel %vm456_vm5, %v909_v37, 2147483647 }
0x10e7   :  { %v912_v29 = vshra.s32 %v910_v49, 16  ;;  %v911_v33 = vand.u32 65535, %v910_v49 }
0x10e9   :  { %v914_v30 = vcvt.s32.f32 %v912_v29  ;;  %v913_v22 = vcvt.s32.f32 %v911_v33 }
0x10eb   :  { %915 = vmin.xlane.f32.xlu1 %v914_v30 }
0x10fc   :  { %974 = vperm.xlu1 %2195, %v2747_v42  }
0x1178   :  { %v916_v44 = vpop.xlane.xlu1 %915 }
0x1179   :  { %vm917_vm6 = vcmp.eq.f32.partialorder %v914_v30, %v916_v44  ;;  %v922_v0 = vcvt.f32.s32 %v916_v44 }
0x117a   :  { %v918_v53 = vsel %vm917_vm6, %v913_v22, inf }
0x117b   :  { %919 = vmin.xlane.f32.xlu0 %v918_v53  ;;  %v923_v4 = vshll.u32 %v922_v0, 16 }
0x117c   :  { %v2822_v50 = vpop.permute.xlu1 %974 }
0x117d   :  { %v977_v61 = vmul.f32 %v2822_v50, %v971_v5 }
0x117f   :  { %v2826_v36 = vadd.f32 %v977_v61, %v2786_v62 }
0x1208   :  { %v920_v7 = vpop.xlane.xlu0 %919 }
0x1209   :  { %v921_v8 = vcvt.f32.s32 %v920_v7 }
0x120b   :  { %v2830_v60 = vadd.s32 %v923_v4, %v921_v8 }
0x120d   :  { %v926_v26 = vadd.s32 %v925_v12, %v2830_v60 }
0x120f   :  { %v986_v37 = vsub.s32 %v926_v26, %v2713_v9  ;;  %vm989_vm7 = vcmp.ge.s32.totalorder %v926_v26, %v2452_v15 }
0x1210   :  { %v1934_v5 = vsel %vm989_vm7, 1.0, %v2333_v35 }
0x1211   :  { %v987_v49 = vmul.u32 %v2183_v27, %v986_v37  ;;  %v992_v29 = vsel %vm527_vm12, %v1934_v5, inf  ;;  %v982_v27 = vsub.f32 %v2809_v54, %v2721_v13 }
0x1212   :  { %v993_v30 = vrot.slane %v992_v29, 4 }
0x1213   :  { %v2838_v33 = vadd.s32 %v987_v49, %v2713_v9 }
0x1214   :  { %v994_v25 = vmin.f32 %v992_v29, %v993_v30 }
0x1215   :  { %vm1001_vm8 = vcmp.ge.s32.totalorder %v2838_v33, %v2452_v15 }
0x1216   :  { %v995_v44 = vrot.slane %v994_v25, 2  ;;  %v2844_v22 = vsel %vm1001_vm8, %v2459_v17, %v2838_v33  ;;  %v2849_v4 = vsel %vm1001_vm8, 1.0, %v2333_v35 }
0x1217   :  { %v1017_v53 = vadd.s32 %v2844_v22, %v2455_v16  ;;  %v1179_v15 = vsub.f32 1.0, %v2849_v4 }
0x1218   :  { %v996_v61 = vmin.f32 %v994_v25, %v995_v44 }
0x1219   :  { %1019 = vperm.xlu0 %2194, %v1017_v53  }
0x121a   :  { %v997_v0 = vrot.slane %v996_v61, 1 }
0x121c   :  { %v998_v7 = vmin.f32 %v996_v61, %v997_v0 }
0x121e   :  { %v999_v9 = vsub.f32 1.0, %v998_v7 }
0x1220   :  { %v2852_v8 = vmul.f32 %v999_v9, %v2747_v42 }
0x1222   :  { %v2856_v12 = vmul.f32 %v1179_v15, %v2852_v8 }
0x1224   :  { %v2860_v24 = vadd.f32 %v2856_v12, %v2759_v59  ;;  %v983_v59 = vmul.f32 %v982_v27, %v2822_v50 }
0x1226   :  { %v2872_v37 = vadd.f32 %v983_v59, %v2721_v13  ;;  %v979_v13 = vsub.f32 %v2778_v47, %v2775_v31 }
0x1228   :  { %v980_v0 = vmul.f32 %v979_v13, %v2822_v50 }
0x122a   :  { %v2881_v7 = vadd.f32 %v980_v0, %v2775_v31  ;;  %v1159_v0 = vadd.s32 1, %v2844_v22 }
0x1298   :  { %v1020_v26 = vpop.permute.xlu0 %1019 }
0x1299   :  { %vm1021_vm9 = vcmp.eq.s32.totalorder %v2535_v14, %v1020_v26 }
0x129a   :  { %vm1937_vm10 = vmpackc.low %vm1021_vm9, %vm1021_vm9  ;;  %vm491_vm9 = vcmp.eq.s32.totalorder %v2535_v14, %v2626_v20 }
0x129b   :  { %2157 = vmatmul.mubr.msk.bf16.vlgmr.msra.gmra.mrb[28].mxu1 %vm1937_vm10, %v2335_v2  ;;  %vm939_vm10 = vcmp.eq.s32.totalorder %v2535_v14, %v2830_v60 }
0x129c   :  { %1331 = vmatpush1.bf16.msra.mxu1 %v2578_v38  ;;  %1362 = vmatprep.mubr.bf16.mxu1 %v2332_v6 }
0x129d   :  { %1332 = vmatprep.subr.bf16.mxu1 %v2583_v39 }
0x12a0   :  { %1333 = vmatpush1.bf16.msra.mxu1 %v2591_v40 }
0x136e   :  { %v1059_v5 = vpop.f32.mrb[28].mxu1 }
0x136f   :  { %v1060_v49 = vadd.f32 %v1059_v5, %v2872_v37  ;;  %v2158_v29 = vpop.f32.mrb[29].mxu1 }
0x1370   :  { %v1062_v30 = vpop.f32.mrb[30].mxu1 }
0x1371   :  { %2262 = vtanh.f32 %v1060_v49  ;;  %v2159_v38 = vpop.f32.mrb[31].mxu1  ;;  %v1939_v39 = vmul.f32 -1.442695, %v1060_v49 }
0x1373   :  { %2264 = vpow2.f32 %v1939_v39 }
0x137b   :  { %v2263_v25 = vpop.eup %2262 }
0x137c   :  { %1074 = vrot.lane.b32.xlu1 %v2263_v25, %s2336_s0 }
0x137d   :  { %v2265_v40 = vpop.eup %2264 }
0x137e   :  { %v1068_v44 = vadd.f32 1.0, %v2265_v40 }
0x1380   :  { %2266 = vrcp.f32 %v1068_v44 }
0x138a   :  { %v2267_v54 = vpop.eup %2266 }
0x138b   :  { %v1072_v9 = vmul.f32 %v2267_v54, %v2881_v7 }
0x13ee   :  { %v1075_v53 = vpop.permute.xlu1 %1074 }
0x13ef   :  { %v1077_v61 = vmul.f32 %v2267_v54, %v1075_v53 }
0x13f1   :  { %1079 = vrot.lane.b32.xlu0 %v1077_v61, %s2336_s0 }
0x1463   :  { %v1080_v15 = vpop.permute.xlu0 %1079 }
0x1464   :  { %v2884_v26 = vadd.f32 %v1080_v15, %v1072_v9  ;;  %v2184_v9 = vtrunc.f32 %v2852_v8 }
0x1466   :  { %2268 = vtanh.f32 %v2884_v26 }
0x1470   :  { %v2269_v27 = vpop.eup %2268 }
0x1471   :  { %1085 = vrot.lane.b32.xlu1 %v2269_v27, %s2336_s0 }
0x14e3   :  { %v1086_v59 = vpop.permute.xlu1 %1085 }
0x14e4   :  { %v1088_v5 = vmul.f32 %v2267_v54, %v1086_v59  ;;  %v2185_v59 = vcvt.f32.s32 %v2184_v9 }
0x14e6   :  { %v1089_v49 = vpack.c.bf16 %v1088_v5, %v1088_v5  ;;  %v1205_v47 = vsub.f32 %v1088_v5, %v2826_v36 }
0x14e8   :  { %1091 = vrot.lane.b32.xlu0 %v1089_v49, %s2337_s24  ;;  %v2306_v49 = vld [vmem:[%s3265_s2] sm:$0xff] }
0x155a   :  { %v1092_v50 = vpop.permute.xlu0 %1091 }
0x155b   :  { %1940 = vmatmul.mubr.msk.bf16.vlgmr.msra.gmra.mrb[12].mxu0 %vm159_vm0, %v1092_v50 }
0x155c   :  { %2161 = vmatpush3.bf16.msra.mxu0 %v2513_v46  ;;  %2176 = vmatprep.mubr.msk.bf16.mxu0 %vm2334_vm2, %v2333_v35 }
0x155d   :  { %2162 = vmatprep.subr.bf16.mxu0 %v2333_v35 }
0x1560   :  { %2163 = vmatpush3.bf16.msra.mxu0 %v2511_v45 }
0x1561   :  { %2164 = vmatprep.subr.bf16.mxu0 %v2333_v35 }
0x1564   :  { %2165 = vmatpush3.bf16.msra.mxu0 %v2521_v56 }
0x1565   :  { %2166 = vmatprep.subr.bf16.mxu0 %v2333_v35 }
0x1568   :  { %2167 = vmatpush3.bf16.msra.mxu0 %v2518_v55  ;;  %v73_v55 = vld [vmem:[%s3267_s4 + $0x18] sm:$0xff] }
0x1569   :  { %2168 = vmatprep.subr.bf16.mxu0 %v2333_v35 }
0x156c   :  { %2169 = vmatpush3.bf16.msra.mxu0 %v2529_v3 }
0x156d   :  { %2170 = vmatprep.subr.bf16.mxu0 %v2333_v35 }
0x1570   :  { %2171 = vmatpush3.bf16.msra.mxu0 %v2526_v1 }
0x1571   :  { %2172 = vmatprep.subr.bf16.mxu0 %v2333_v35 }
0x1574   :  { %2173 = vmatpush3.bf16.msra.mxu0 %v2540_v19 }
0x1575   :  { %2174 = vmatprep.subr.bf16.mxu0 %v2333_v35 }
0x1578   :  { %2175 = vmatpush3.bf16.msra.mxu0 %v2537_v18 }
0x162e   :  { %v2908_v45 = vpop.f32.mrb[12].mxu0 }
0x162f   :  { %v1132_v46 = vpop.f32.mrb[13].mxu0 }
0x1630   :  { %v2914_v56 = vadd.f32 %v2611_v48, %v1132_v46  ;;  %v1134_v3 = vpop.f32.mrb[14].mxu0 }
0x1631   :  { %v1135_v1 = vpop.f32.mrb[15].mxu0 }
0x1632   :  { %v1138_v31 = vadd.f32 %v2914_v56, %v73_v55 }
0x1634   :  { %v1139_v19 = vsel %vm456_vm5, %v1138_v31, -inf }
0x1635   :  { %1140 = vmax.xlane.f32.xlu1 %v1139_v19 }
0x16c2   :  { %v1141_v29 = vpop.xlane.xlu1 %1140 }
0x16c3   :  { %vm1142_vm2 = vcmp.ge.f32.partialorder %v1138_v31, %v1141_v29 }
0x16c4   :  { %v1143_v18 = vsel %vm1142_vm2, %v2535_v14, 4  ;;  %vm705_vm2 = vcmp.eq.s32.totalorder %v2535_v14, %v2702_v58  ;;  %v513_v58 = vmul.f32 %v2619_v52, %v2619_v52 }
0x16c5   :  { %v1144_v30 = vsel %vm456_vm5, %v1143_v18, 2147483647 }
0x16c6   :  { %v1146_v38 = vshra.s32 %v1144_v30, 16  ;;  %v1145_v39 = vand.u32 65535, %v1144_v30 }
0x16c8   :  { %v1148_v25 = vcvt.s32.f32 %v1146_v38  ;;  %v1147_v48 = vcvt.s32.f32 %v1145_v39 }
0x16ca   :  { %1149 = vmin.xlane.f32.xlu0 %v1148_v25 }
0x1757   :  { %v1150_v40 = vpop.xlane.xlu0 %1149 }
0x1758   :  { %vm1151_vm11 = vcmp.eq.f32.partialorder %v1148_v25, %v1150_v40  ;;  %v1156_v54 = vcvt.f32.s32 %v1150_v40 }
0x1759   :  { %v1152_v44 = vsel %vm1151_vm11, %v1147_v48, inf }
0x175a   :  { %1153 = vmin.xlane.f32.xlu0 %v1152_v44  ;;  %v1157_v61 = vshll.u32 %v1156_v54, 16 }
0x1770   :  { %1208 = vperm.xlu0 %2194, %v2852_v8  }
0x17e7   :  { %v1154_v53 = vpop.xlane.xlu0 %1153 }
0x17e8   :  { %v1155_v13 = vcvt.f32.s32 %v1154_v53 }
0x17ea   :  { %v2923_v15 = vadd.s32 %v1157_v61, %v1155_v13 }
0x17ec   :  { %v1160_v27 = vadd.s32 %v1159_v0, %v2923_v15  ;;  %vm1173_vm11 = vcmp.eq.s32.totalorder %v2535_v14, %v2923_v15  ;;  %v728_v15 = vmul.f32 %v2686_v63, %v2686_v63 }
0x17ee   :  { %v1220_v5 = vsub.s32 %v1160_v27, %v2838_v33  ;;  %vm1223_vm13 = vcmp.ge.s32.totalorder %v1160_v27, %v2306_v49 }
0x17ef   :  { %v1941_v50 = vsel %vm1223_vm13, 1.0, %v2333_v35  ;;  %v1209_v46 = vpop.permute.xlu0 %1208 }
0x17f0   :  { %v1221_v55 = vmul.u32 %v2185_v59, %v1220_v5  ;;  %v1226_v22 = vsel %vm527_vm12, %v1941_v50, inf  ;;  %v1211_v3 = vmul.f32 %v1209_v46, %v1205_v47 }
0x17f1   :  { %v1227_v1 = vrot.slane %v1226_v22, 4 }
0x17f2   :  { %v2933_v31 = vadd.f32 %v1211_v3, %v2826_v36  ;;  %v1222_v19 = vadd.s32 %v1221_v55, %v2838_v33  ;;  %v1005_v3 = vmul.f32 %v2849_v4, %v2852_v8 }
0x17f3   :  { %v1228_v29 = vmin.f32 %v1226_v22, %v1227_v1 }
0x17f4   :  { %vm1235_vm14 = vcmp.ge.s32.totalorder %v1222_v19, %v2306_v49 }
0x17f5   :  { %v1229_v18 = vrot.slane %v1228_v29, 2  ;;  %v1238_v30 = vsel %vm1235_vm14, %v2459_v17, %v1222_v19  ;;  %v1942_v48 = vsel %vm1235_vm14, 1.0, %v2333_v35 }
0x17f6   :  { %v1251_v38 = vadd.s32 %v1238_v30, %v2455_v16  ;;  %v1410_v54 = vsub.f32 1.0, %v1942_v48  ;;  %v1216_v16 = vsub.f32 %v2908_v45, %v2872_v37 }
0x17f7   :  { %v1230_v25 = vmin.f32 %v1228_v29, %v1229_v18  ;;  %v1213_v29 = vsub.f32 %v2884_v26, %v2881_v7 }
0x17f8   :  { %1253 = vperm.xlu1 %2195, %v1251_v38   ;;  %v1217_v61 = vmul.f32 %v1216_v16, %v1209_v46 }
0x17f9   :  { %v1231_v39 = vrot.slane %v1230_v25, 1  ;;  %v1214_v18 = vmul.f32 %v1213_v29, %v1209_v46 }
0x17fa   :  { %v1218_v13 = vadd.f32 %v1217_v61, %v2872_v37  ;;  %v782_v37 = vadd.f32 %v2756_v57, %v2744_v34 }
0x17fb   :  { %v1232_v40 = vmin.f32 %v1230_v25, %v1231_v39  ;;  %v1215_v30 = vadd.f32 %v1214_v18, %v2881_v7 }
0x17fc   :  { %v1006_v1 = vsub.f32 1.0, %v782_v37 }
0x17fd   :  { %v1233_v47 = vsub.f32 1.0, %v1232_v40 }
0x17fe   :  { %v1007_v19 = vmul.f32 %v1006_v1, %v1005_v3 }
0x17ff   :  { %v2940_v44 = vmul.f32 %v1233_v47, %v2852_v8 }
0x1800   :  { %v1016_v40 = vadd.f32 %v1007_v19, %v782_v37  ;;  %v2210_v37 = vld [vmem:[%s3273_s10 + $0x30] ss:$8 sps:$4 sm:$0xff]  }
0x1801   :  { %v2943_v33 = vmul.f32 %v1410_v54, %v2940_v44 }
0x1802   :  { %v1240_v46 = vsub.f32 1.0, %v1016_v40 }
0x1803   :  { %v2947_v53 = vadd.f32 %v2943_v33, %v2860_v24 }
0x1877   :  { %v1254_v17 = vpop.permute.xlu1 %1253 }
0x1878   :  { %vm1255_vm15 = vcmp.eq.s32.totalorder %v2535_v14, %v1254_v17  ;;  %v1239_v17 = vmul.f32 %v1942_v48, %v2940_v44  ;;  %v2206_v48 = vld [vmem:[%s3273_s10 + $0x24] ss:$8 sps:$4 sm:$0xff]  }
0x1879   :  { %vm1944_vm1 = vmpackc.low %vm1255_vm15, %vm1255_vm15  ;;  %1484 = vmatprep.subr.bf16.mxu1 %v2206_v48 }
0x187a   :  { %2177 = vmatmul.mubr.msk.bf16.vlgmr.msra.gmra.mrb[16].mxu0 %vm1944_vm1, %v2335_v2 }
0x187b   :  { %1580 = vmatprep.mubr.bf16.mxu0 %v2332_v6 }
0x194d   :  { %v1293_v0 = vpop.f32.mrb[16].mxu0 }
0x194e   :  { %v1294_v9 = vadd.f32 %v1293_v0, %v1218_v13  ;;  %v2178_v27 = vpop.f32.mrb[17].mxu0  ;;  %v1241_v13 = vmul.f32 %v1240_v46, %v1239_v17  ;;  %v2221_v46 = vld [vmem:[%s3273_s10 + $0x54] ss:$8 sps:$4 sm:$0xff]  }
0x194f   :  { %v1296_v59 = vpop.f32.mrb[18].mxu0 }
0x1950   :  { %2270 = vtanh.f32 %v1294_v9  ;;  %v2179_v24 = vpop.f32.mrb[19].mxu0  ;;  %v1946_v49 = vmul.f32 -1.442695, %v1294_v9  ;;  %v1250_v9 = vadd.f32 %v1241_v13, %v1016_v40  ;;  %v2207_v59 = vld [vmem:[%s3273_s10] ss:$8 sps:$4 sm:$0xff]  }
0x1951   :  { %v2209_v24 = vld [vmem:[%s3273_s10 + $0x4] ss:$8 sps:$4 sm:$0xff]  }
0x1952   :  { %2272 = vpow2.f32 %v1946_v49  ;;  %vm1444_vm3 = vcmp.gt.f32.partialorder %v1250_v9, 0.5  ;;  %1548 = vmatprep.subr.bf16.mxu0 %v2209_v24  ;;  %v67_v49 = vld [vmem:[%s3264_s1] sm:$0xff] }
0x1953   :  { %v1445_v27 = vsel %vm1444_vm3, 1, %v2332_v6  ;;  %1549 = vmatpush1.bf16.msra.mxu0 %v2207_v59  ;;  %v74_v59 = vld [vmem:[%s3267_s4 + $0x20] sm:$0xff] }
0x1954   :  { %v2307_v24 = vld [vmem:[%s3272_s9] ss:$0 sm:$0xff] }
0x195a   :  { %v2271_v5 = vpop.eup %2270 }
0x195b   :  { %1308 = vrot.lane.b32.xlu1 %v2271_v5, %s2336_s0  ;;  %v2213_v5 = vld [vmem:[%s3273_s10 + $0x10] ss:$8 sps:$4 sm:$0xff]  }
0x195c   :  { %v2273_v2 = vpop.eup %2272 }
0x195d   :  { %v1302_v50 = vadd.f32 1.0, %v2273_v2  ;;  %v294_v2 = vpack.c.bf16 %v67_v49, %v67_v49 }
0x195f   :  { %2274 = vrcp.f32 %v1302_v50  ;;  %v2204_v50 = vld [vmem:[%s3273_s10 + $0x20] ss:$8 sps:$4 sm:$0xff]  }
0x1969   :  { %v2275_v55 = vpop.eup %2274 }
0x196a   :  { %v1306_v38 = vmul.f32 %v2275_v55, %v1215_v30 }
0x19cd   :  { %v1309_v22 = vpop.permute.xlu1 %1308 }
0x19ce   :  { %v1311_v45 = vmul.f32 %v2275_v55, %v1309_v22 }
0x19d0   :  { %1313 = vrot.lane.b32.xlu1 %v1311_v45, %s2336_s0 }
0x19d4   :  { %302 = vperm.xlu1 %2195, %v2718_v11  }
0x19d8   :  { %543 = vperm.xlu1 %2195, %v2736_v28  }
0x19dc   :  { %1011 = vperm.xlu1 %2195, %v1007_v19  }
0x19e0   :  { %1439 = vperm.xlu1 %2195, %v2940_v44  }
0x1a42   :  { %v1314_v34 = vpop.permute.xlu1 %1313 }
0x1a43   :  { %v1316_v25 = vadd.f32 %v1314_v34, %v1306_v38 }
0x1a45   :  { %2276 = vtanh.f32 %v1316_v25  ;;  %v2218_v25 = vld [vmem:[%s3273_s10 + $0x44] ss:$8 sps:$4 sm:$0xff]  }
0x1a4f   :  { %v2277_v11 = vpop.eup %2276 }
0x1a50   :  { %1319 = vrot.lane.b32.xlu0 %v2277_v11, %s2336_s0 }
0x1a53   :  { %v303_v4 = vpop.permute.xlu1 %302 }
0x1a54   :  { %v305_v22 = vmul.f32 0.0, %v303_v4 }
0x1a56   :  { %v540_v3 = vsub.f32 %v2597_v43, %v305_v22 }
0x1a57   :  { %v544_v28 = vpop.permute.xlu1 %543 }
0x1a58   :  { %v546_v1 = vmul.f32 %v544_v28, %v540_v3 }
0x1a5a   :  { %v547_v19 = vadd.f32 %v546_v1, %v305_v22  ;;  %v2226_v22 = vld [vmem:[%s3275_s12 + $0x50] sm:$0xff]   ;;  %v2228_v1 = vld [vmem:[%s3275_s12 + $0x58] sm:$0xff]  }
0x1a5b   :  { %v1012_v39 = vpop.permute.xlu1 %1011 }
0x1a5c   :  { %v774_v29 = vsub.f32 %v2786_v62, %v547_v19 }
0x1a5f   :  { %v1440_v7 = vpop.permute.xlu1 %1439 }
0x1ac2   :  { %v1320_v47 = vpop.permute.xlu0 %1319 }
0x1ac3   :  { %v1322_v54 = vmul.f32 %v2275_v55, %v1320_v47  ;;  %v2212_v55 = vld [vmem:[%s3273_s10 + $0x34] ss:$8 sps:$4 sm:$0xff]  }
0x1ac5   :  { %v1323_v16 = vpack.c.bf16 %v1322_v54, %v1322_v54  ;;  %v1436_v26 = vsub.f32 %v1322_v54, %v2933_v31 }
0x1ac7   :  { %v1442_v61 = vmul.f32 %v1440_v7, %v1436_v26  ;;  %1325 = vrot.lane.b32.xlu0 %v1323_v16, %s2337_s24  ;;  %v2225_v16 = vld [vmem:[%s3275_s12 + $0x8] sm:$0xff]  }
0x1ac8   :  { %v2216_v26 = vld [vmem:[%s3273_s10 + $0x40] ss:$8 sps:$4 sm:$0xff]  }
0x1ac9   :  { %v1443_v0 = vadd.f32 %v1442_v61, %v2933_v31 }
0x1acb   :  { %777 = vperm.xlu0 %2194, %v2756_v57   ;;  %v2215_v57 = vld [vmem:[%s3273_s10 + $0x14] ss:$8 sps:$4 sm:$0xff]  }
0x1acc   :  { %1550 = vmatprep.subr.bf16.mxu0 %v2215_v57 }
0x1acd   :  { %1551 = vmatpush1.bf16.msra.mxu0 %v2213_v5 }
0x1acf   :  { %1245 = vperm.xlu0 %2194, %v1241_v13   ;;  %v2219_v13 = vld [vmem:[%s3273_s10 + $0x50] ss:$8 sps:$4 sm:$0xff]  }
0x1ad0   :  { %1957 = vmatmul.mubr.msk.bf16.vlgmr.msra.gmra.mrb[20].mxu0 %vm159_vm0, %v294_v2 }
0x1ad3   :  { %1447 = vperm.xlu0 %2194, %v1445_v27  }
0x1b39   :  { %v1326_v45 = vpop.permute.xlu0 %1325 }
0x1b3a   :  { %1947 = vmatmul.mubr.msk.bf16.vlgmr.msra.gmra.mrb[32].mxu1 %vm159_vm0, %v1326_v45  ;;  %v2227_v45 = vld [vmem:[%s3275_s12 + $0x10] sm:$0xff]  }
0x1b3b   :  { %1485 = vmatpush1.bf16.msra.mxu1 %v2204_v50  ;;  %1516 = vmatprep.mubr.bf16.mxu1 %v2332_v6  ;;  %v693_v50 = vsel %vm456_vm5, %v2686_v63, -inf }
0x1b3c   :  { %1486 = vmatprep.subr.bf16.mxu1 %v2212_v55  ;;  %v1161_v55 = vsel %vm456_vm5, %v2914_v56, -inf }
0x1b3f   :  { %1487 = vmatpush1.bf16.msra.mxu1 %v2210_v37 }
0x1b40   :  { %1612 = vmatprep.subr.bf16.mxu1 %v2218_v25  ;;  %v2233_v25 = vld [vmem:[%s3275_s12 + $0x28] sm:$0xff]  }
0x1b4a   :  { %v778_v18 = vpop.permute.xlu0 %777 }
0x1b4b   :  { %v780_v30 = vmul.f32 %v778_v18, %v774_v29 }
0x1b4d   :  { %v781_v38 = vadd.f32 %v780_v30, %v547_v19  ;;  %v2229_v19 = vld [vmem:[%s3275_s12 + $0x18] sm:$0xff]   ;;  %v2230_v30 = vld [vmem:[%s3275_s12 + $0x60] sm:$0xff]  }
0x1b4e   :  { %v1246_v4 = vpop.permute.xlu0 %1245 }
0x1b4f   :  { %v1008_v34 = vsub.f32 %v2826_v36, %v781_v38  ;;  %v2222_v36 = vld [vmem:[%s3275_s12 + $0x40] sm:$0xff]  }
0x1b50   :  { %2038 = vmatprep.subr.bf16.mxu0 %v2222_v36 }
0x1b51   :  { %v1014_v11 = vmul.f32 %v1012_v39, %v1008_v34  ;;  %v2223_v39 = vld [vmem:[%s3275_s12] sm:$0xff]   ;;  %v2232_v34 = vld [vmem:[%s3275_s12 + $0x68] sm:$0xff]  }
0x1b52   :  { %v1448_v28 = vpop.permute.xlu0 %1447  ;;  %2039 = vmatpush3.bf16.msra.mxu0 %v2223_v39 }
0x1b53   :  { %v1015_v40 = vadd.f32 %v1014_v11, %v781_v38  ;;  %vm1449_vm4 = vcmp.eq.s32.totalorder %v1448_v28, 1  ;;  %v2231_v38 = vld [vmem:[%s3275_s12 + $0x20] sm:$0xff]   ;;  %v2234_v11 = vld [vmem:[%s3275_s12 + $0x70] sm:$0xff]  }
0x1b55   :  { %v1242_v43 = vsub.f32 %v2933_v31, %v1015_v40  ;;  %v2224_v31 = vld [vmem:[%s3275_s12 + $0x48] sm:$0xff]  }
0x1b56   :  { %2040 = vmatprep.subr.bf16.mxu0 %v2224_v31 }
0x1b57   :  { %v1248_v47 = vmul.f32 %v1246_v4, %v1242_v43  ;;  %2041 = vmatpush3.bf16.msra.mxu0 %v2225_v16  ;;  %v2235_v4 = vld [vmem:[%s3275_s12 + $0x30] sm:$0xff]   ;;  %v2237_v43 = vld [vmem:[%s3275_s12 + $0x38] sm:$0xff]  }
0x1b58   :  { %2042 = vmatprep.subr.bf16.mxu0 %v2226_v22  ;;  %v927_v22 = vsel %vm456_vm5, %v2815_v23, -inf }
0x1b59   :  { %v1249_v54 = vadd.f32 %v1248_v47, %v1015_v40  ;;  %v2236_v40 = vld [vmem:[%s3275_s12 + $0x78] sm:$0xff]  }
0x1b5b   :  { %v1450_v62 = vsel %vm1449_vm4, %v1249_v54, %v1443_v0  ;;  %2043 = vmatpush3.bf16.msra.mxu0 %v2227_v45 }
0x1b5c   :  { %1453 = vrot.lane.b32.xlu0 %v1450_v62, %s2337_s24  ;;  %v1451_v17 = vpack.c.bf16 %v1450_v62, %v1450_v62  ;;  %2044 = vmatprep.subr.bf16.mxu0 %v2228_v1 }
0x1b5e   :  { %1459 = vrot.lane.b32.xlu1 %v1451_v17, %s2337_s24 }
0x1b5f   :  { %2045 = vmatpush3.bf16.msra.mxu0 %v2229_v19 }
0x1b60   :  { %2046 = vmatprep.subr.bf16.mxu0 %v2230_v30 }
0x1b63   :  { %2047 = vmatpush3.bf16.msra.mxu0 %v2231_v38 }
0x1b64   :  { %2048 = vmatprep.subr.bf16.mxu0 %v2232_v34 }
0x1b67   :  { %2049 = vmatpush3.bf16.msra.mxu0 %v2233_v25 }
0x1b68   :  { %2050 = vmatprep.subr.bf16.mxu0 %v2234_v11 }
0x1b6b   :  { %2051 = vmatpush3.bf16.msra.mxu0 %v2235_v4 }
0x1b6c   :  { %2052 = vmatprep.subr.bf16.mxu0 %v2236_v40 }
0x1b6f   :  { %2053 = vmatpush3.bf16.msra.mxu0 %v2237_v43 }
0x1ba3   :  { %v1582_v37 = vpop.f32.mrb[20].mxu0 }
0x1ba4   :  { %v1584_v3 = vpop.f32.mrb[21].mxu0 }
0x1ba5   :  { %v1586_v29 = vpop.f32.mrb[22].mxu0 }
0x1ba6   :  { %v1587_v18 = vpop.f32.mrb[23].mxu0 }
0x1bce   :  { %v1454_v7 = vpop.permute.xlu0 %1453 }
0x1bcf   :  { %v1456_v0 = vmul.f32 %v1454_v7, %v67_v49  ;;  %v1658_v7 = vsub.s32 0, %v2438_v10 }
0x1bd0   :  { %v1460_v61 = vpop.permute.xlu1 %1459 }
0x1bd1   :  { %1952 = vmatmul.mubr.msk.bf16.vlgmr.msra.gmra.mrb[36].mxu1 %vm159_vm0, %v1460_v61  ;;  %v1457_v9 = vpack.c.bf16 %v1456_v0, %v1456_v0  ;;  %v99_v61 = vld [vmem:[%s3274_s11] sm:$0x3] }
0x1bd2   :  { %1613 = vmatpush1.bf16.msra.mxu1 %v2216_v26  ;;  %1644 = vmatprep.mubr.bf16.mxu1 %v2332_v6  ;;  %v1659_v0 = vrot.slane %v99_v61, %v1658_v7 }
0x1bd3   :  { %1614 = vmatprep.subr.bf16.mxu1 %v2221_v46 }
0x1bd6   :  { %1615 = vmatpush1.bf16.msra.mxu1 %v2219_v13  ;;  %v1662_v13 = vsub.s32 1, %v2438_v10  ;;  %v76_v10 = vld [vmem:[%s3268_s5 + $0x8] sm:$0xff] }
0x1bd9   :  { %1962 = vmatmul.mubr.msk.bf16.vlgmr.msra.gmra.mrb[40].mxu1 %vm159_vm0, %v1457_v9 }
0x1c0d   :  { %v1364_v27 = vpop.f32.mrb[32].mxu1 }
0x1c0e   :  { %v1365_v48 = vpop.f32.mrb[33].mxu1  ;;  %v479_v27 = vsel %vm456_vm5, %v2619_v52, -inf }
0x1c0f   :  { %v3043_v57 = vadd.f32 %v2307_v24, %v1365_v48  ;;  %v1367_v5 = vpop.f32.mrb[34].mxu1  ;;  %v1663_v48 = vrot.slane %v99_v61, %v1662_v13 }
0x1c10   :  { %v1368_v6 = vpop.f32.mrb[35].mxu1  ;;  %v75_v5 = vld [vmem:[%s3268_s5] sm:$0xff]  ;;  %s2338_s5 = smov 124  }
0x1c11   :  { %v1371_v49 = vadd.f32 %v3043_v57, %v74_v59  ;;  %v1392_v1 = vsel %vm456_vm5, %v3043_v57, -inf }
0x1c13   :  { %v1372_v2 = vsel %vm456_vm5, %v1371_v49, -inf }
0x1c14   :  { %1373 = vmax.xlane.f32.xlu1 %v1372_v2 }
0x1c18   :  { %694 = vmax.xlane.f32.xlu1 %v693_v50 }
0x1c1c   :  { %1162 = vmax.xlane.f32.xlu1 %v1161_v55 }
0x1ca1   :  { %v1374_v47 = vpop.xlane.xlu1 %1373 }
0x1ca2   :  { %vm1375_vm0 = vcmp.ge.f32.partialorder %v1371_v49, %v1374_v47 }
0x1ca3   :  { %v1376_v28 = vsel %vm1375_vm0, %v2535_v14, 4 }
0x1ca4   :  { %v1377_v54 = vsel %vm456_vm5, %v1376_v28, 2147483647  ;;  %v1518_v62 = vpop.f32.mrb[36].mxu1 }
0x1ca5   :  { %v1583_v17 = vadd.f32 %v1582_v37, %v1518_v62  ;;  %v1520_v36 = vpop.f32.mrb[37].mxu1  ;;  %v1379_v39 = vshra.s32 %v1377_v54, 16  ;;  %v3106_v34 = vpop.xlane.xlu1 %694  ;;  %v1378_v47 = vand.u32 65535, %v1377_v54 }
0x1ca6   :  { %v1585_v31 = vadd.f32 %v1584_v3, %v1520_v36  ;;  %v1522_v16 = vpop.f32.mrb[38].mxu1  ;;  %v696_v25 = vsub.f32 %v2686_v63, %v3106_v34 }
0x1ca7   :  { %v1523_v26 = vpop.f32.mrb[39].mxu1  ;;  %v1381_v46 = vcvt.s32.f32 %v1379_v39  ;;  %v1380_v62 = vcvt.s32.f32 %v1378_v47 }
0x1ca8   :  { %v697_v4 = vmul.f32 1.442695, %v696_v25 }
0x1ca9   :  { %1382 = vmin.xlane.f32.xlu0 %v1381_v46  ;;  %v3110_v11 = vpop.xlane.xlu1 %1162 }
0x1caa   :  { %v1164_v40 = vsub.f32 %v2914_v56, %v3110_v11  ;;  %2278 = vpow2.f32 %v697_v4 }
0x1cac   :  { %v1646_v9 = vpop.f32.mrb[40].mxu1  ;;  %v1165_v43 = vmul.f32 1.442695, %v1164_v40  ;;  %v736_v40 = vadd.f32 1.0, %v2697_v41 }
0x1cad   :  { %v1653_v59 = vadd.f32 %v1646_v9, %v1583_v17  ;;  %480 = vmax.xlane.f32.xlu0 %v479_v27  ;;  %v1648_v24 = vpop.f32.mrb[41].mxu1 }
0x1cae   :  { %v1654_v6 = vadd.f32 %v1648_v24, %v1585_v31  ;;  %v1650_v49 = vpop.f32.mrb[42].mxu1  ;;  %2280 = vpow2.f32 %v1165_v43  ;;  %v970_v43 = vadd.f32 %v2747_v42, %v736_v40 }
0x1caf   :  { %v1666_v2 = vadd.f32 %v1659_v0, %v1653_v59  ;;  %v1651_v50 = vpop.f32.mrb[43].mxu1  ;;  %v492_v0 = vsel %vm491_vm9, %v2619_v52, 0.0  ;;  %v940_v59 = vsel %vm939_vm10, %v2815_v23, 0.0 }
0x1cb0   :  { %v1667_v55 = vadd.f32 %v1663_v48, %v1654_v6  ;;  %v493_v20 = vsel %vm456_vm5, %v492_v0, 0.0  ;;  %v941_v24 = vsel %vm456_vm5, %v940_v59, 0.0  ;;  %v706_v50 = vsel %vm705_vm2, %v2686_v63, 0.0 }
0x1cb1   :  { %v1668_v45 = vmul.f32 %v1666_v2, %v75_v5  ;;  %928 = vmax.xlane.f32.xlu0 %v927_v22  ;;  %v1174_v22 = vsel %vm1173_vm11, %v2914_v56, 0.0  ;;  %v1204_v47 = vadd.f32 %v2852_v8, %v970_v43 }
0x1cb2   :  { %v1669_v37 = vmul.f32 %v1667_v55, %v76_v10  ;;  %v707_v55 = vsel %vm456_vm5, %v706_v50, 0.0 }
0x1cb3   :  { %vm1670_vm6 = vcmp.ge.f32.partialorder %v1668_v45, 0.0  ;;  %v1672_v3 = vmul.f32 0.01, %v1668_v45 }
0x1cb4   :  { %vm1671_vm7 = vcmp.ge.f32.partialorder %v1669_v37, 0.0  ;;  %v1673_v19 = vmul.f32 0.01, %v1669_v37  ;;  %v2279_v36 = vpop.eup %2278 }
0x1cb5   :  { %1393 = vmax.xlane.f32.xlu0 %v1392_v1  ;;  %v1674_v29 = vsel %vm1670_vm6, %v1668_v45, %v1672_v3  ;;  %v699_v16 = vsel %vm456_vm5, %v2279_v36, 0.0  ;;  %v1175_v45 = vsel %vm456_vm5, %v1174_v22, 0.0  ;;  %v1963_v3 = vld [vmem:[#allocation2] ss:$0 sm:$0xff] }
0x1cb6   :  { %v1675_v18 = vsel %vm1671_vm7, %v1669_v37, %v1673_v19  ;;  %v1676_v38 = vpack.c.bf16 %v1674_v29, %v1674_v29 }
0x1cb7   :  { %v1677_v30 = vpack.c.bf16 %v1675_v18, %v1675_v18 }
0x1cb8   :  { %v2281_v26 = vpop.eup %2280 }
0x1cb9   :  { %1812 = vmatprep.mubr.bf16.mxu0 %v1677_v30  ;;  %v1167_v61 = vsel %vm456_vm5, %v2281_v26, 0.0 }
0x1cba   :  { %1813 = vmatmul.mubr.bf16.vlgmr.msra.gmra.mrb[24].mxu0 %v1676_v38 }
0x1d36   :  { %v3114_v28 = vpop.xlane.xlu0 %1382 }
0x1d37   :  { %vm1384_vm8 = vcmp.eq.f32.partialorder %v1381_v46, %v3114_v28 }
0x1d38   :  { %v1385_v17 = vsel %vm1384_vm8, %v1380_v62, inf  ;;  %v3162_v62 = vadd.f32 %v2940_v44, %v1204_v47 }
0x1d39   :  { %1386 = vmin.xlane.f32.xlu1 %v1385_v17 }
0x1d3a   :  { %v3117_v39 = vpop.xlane.xlu0 %480  ;;  %v1832_v17 = vsub.f32 0.0, %v3162_v62 }
0x1d3b   :  { %v482_v31 = vsub.f32 %v2619_v52, %v3117_v39 }
0x1d3d   :  { %v483_v7 = vmul.f32 1.442695, %v482_v31  ;;  %700 = vadd.xlane.f32.xlu1 %v699_v16  ;;  %v3170_v31 = vld [vmem:[%s3266_s3] sm:$0xff]  ;;  %v1834_v16 = vmul.f32 0.125, %v1832_v17  ;;  %v1427_v17 = vmul.f32 %v3043_v57, %v3043_v57  ;;  %s2339_s3 = smov [#allocation3]  }
0x1d3e   :  { %v3122_v54 = vpop.xlane.xlu0 %928  ;;  %s1890_s15 = sshll.u32 %s2339_s3, 4  ;;  %s1891_s15 = int_to_ptr.vmem [resolvable:$true] %s1890_s15 }
0x1d3f   :  { %2282 = vpow2.f32 %v483_v7  ;;  %v930_v46 = vsub.f32 %v2815_v23, %v3122_v54  ;;  %v1389_v7 = vcvt.f32.s32 %v3114_v28  ;;  %s2308_s1 = scalar_lea.vmem %s1891_s15, 16  ;;  %s2312_s16 = scalar_lea.vmem %s1891_s15, 32 }
0x1d40   :  { %p2309_p0 = scmp.ne.s32.totalorder %s1891_s15, %s2308_s1  ;;  %p2313_p1 = scmp.lt.s32.totalorder %s1891_s15, %s1891_s15 }
0x1d41   :  { %v931_v13 = vmul.f32 1.442695, %v930_v46  ;;  %1168 = vadd.xlane.f32.xlu1 %v1167_v61  ;;  %v1390_v61 = vshll.u32 %v1389_v7, 16  ;;  %p2314_p2 = scmp.lt.s32.totalorder %s2312_s16, %s2308_s1 }
0x1d42   :  { %v3130_v9 = vpop.xlane.xlu0 %1393 }
0x1d43   :  { %2284 = vpow2.f32 %v931_v13  ;;  %v1395_v27 = vsub.f32 %v3043_v57, %v3130_v9  ;;  %p2315_p3 = por %p2314_p2, %p2313_p1 }
0x1d45   :  { %v1396_v48 = vmul.f32 1.442695, %v1395_v27  ;;  %494 = vadd.xlane.f32.xlu1 %v493_v20  ;;  %p2316_p4 = pnand %p2315_p3, %p2309_p0 }
0x1d47   :  { %2286 = vpow2.f32 %v1396_v48 }
0x1d49   :  { %v2283_v5 = vpop.eup %2282  ;;  %942 = vadd.xlane.f32.xlu1 %v941_v24 }
0x1d4a   :  { %v485_v6 = vsel %vm456_vm5, %v2283_v5, 0.0 }
0x1d4b   :  { %486 = vadd.xlane.f32.xlu0 %v485_v6 }
0x1d4d   :  { %v2285_v49 = vpop.eup %2284 }
0x1d4e   :  { %v933_v60 = vsel %vm456_vm5, %v2285_v49, 0.0 }
0x1d4f   :  { %934 = vadd.xlane.f32.xlu0 %v933_v60 }
0x1d51   :  { %v2287_v2 = vpop.eup %2286 }
0x1d52   :  { %v1398_v10 = vsel %vm456_vm5, %v2287_v2, 0.0 }
0x1d53   :  { %1399 = vadd.xlane.f32.xlu0 %v1398_v10 }
0x1d57   :  { %708 = vadd.xlane.f32.xlu0 %v707_v55 }
0x1d5b   :  { %1176 = vadd.xlane.f32.xlu0 %v1175_v45 }
0x1d71   :  { %501 = vrot.lane.b32.xlu0 %v2619_v52, %s2338_s5 }
0x1d75   :  { %515 = vrot.lane.b32.xlu0 %v513_v58, %s2338_s5 }
0x1d79   :  { %730 = vrot.lane.b32.xlu0 %v728_v15, %s2338_s5 }
0x1d8d   :  { %v2054_v37 = vpop.f32.mrb[24].mxu0 }
0x1d8e   :  { %v2055_v1 = vpop.f32.mrb[25].mxu0 }
0x1d8f   :  { %v2056_v19 = vadd.f32 %v2055_v1, %v2054_v37  ;;  %v2057_v29 = vpop.f32.mrb[26].mxu0 }
0x1d90   :  { %v2058_v18 = vpop.f32.mrb[27].mxu0 }
0x1d91   :  { %v1815_v30 = vadd.f32 %v2056_v19, %v1963_v3 }
0x1d93   :  { %v1980_v38 = vmul.f32 -1.442695, %v1815_v30 }
0x1d95   :  { %2288 = vpow2.f32 %v1980_v38 }
0x1d9f   :  { %v2289_v25 = vpop.eup %2288 }
0x1da0   :  { %v1823_v4 = vadd.f32 1.0, %v2289_v25 }
0x1da2   :  { %2290 = vrcp.f32 %v1823_v4 }
0x1dac   :  { %v3165_v36 = vpop.eup %2290 }
0x1dad   :  { %vm1826_vm13 = vcmp.gt.f32.partialorder %v3165_v36, 0.5 }
0x1dae   :  { %v1981_v41 = vsel %vm1826_vm13, 1.0, %v2333_v35 }
0x1daf   :  { %vm1829_vm14 = vcmp.eq.f32.partialorder %v1981_v41, %v3170_v31 }
0x1db0   :  { %v1982_v42 = vsel %vm1829_vm14, 1.0, %v2333_v35 }
0x1db1   :  { %v3176_v8 = vadd.f32 %v1982_v42, %v1834_v16 }
0x1db3   :  { %v1851_v44 = vmul.f32 %v3176_v8, %v3176_v8 }
0x1db5   :  { %v3181_v26 = vmul.f32 %v1851_v44, %v2947_v53 }
0x1dc6   :  { %v1387_v46 = vpop.xlane.xlu1 %1386 }
0x1dc7   :  { %v1388_v13 = vcvt.f32.s32 %v1387_v46 }
0x1dc9   :  { %v1391_v0 = vadd.s32 %v1390_v61, %v1388_v13 }
0x1dca   :  { %v701_v20 = vpop.xlane.xlu1 %700 }
0x1dcb   :  { %vm1404_vm15 = vcmp.eq.s32.totalorder %v2535_v14, %v1391_v0  ;;  %2292 = vlog2.f32 %v701_v20 }
0x1dcc   :  { %v1405_v27 = vsel %vm1404_vm15, %v3043_v57, 0.0 }
0x1dcd   :  { %v1406_v35 = vsel %vm456_vm5, %v1405_v27, 0.0  ;;  %vm1864_vm5 = vcmp.gt.f32.partialorder %v3170_v31, 0.5 }
0x1dce   :  { %1407 = vadd.xlane.f32.xlu1 %v1406_v35  ;;  %v1169_v48 = vpop.xlane.xlu1 %1168 }
0x1dcf   :  { %2294 = vlog2.f32 %v1169_v48 }
0x1dd2   :  { %v495_v50 = vpop.xlane.xlu1 %494 }
0x1dd5   :  { %v2293_v53 = vpop.eup %2292 }
0x1dd6   :  { %v703_v28 = vmul.f32 0.6931472, %v2293_v53  ;;  %v943_v30 = vpop.xlane.xlu1 %942 }
0x1dd8   :  { %v487_v59 = vpop.xlane.xlu0 %486  ;;  %v704_v60 = vadd.f32 %v703_v28, %v3106_v34 }
0x1dd9   :  { %2296 = vlog2.f32 %v487_v59  ;;  %v2295_v5 = vpop.eup %2294 }
0x1dda   :  { %v1171_v49 = vmul.f32 0.6931472, %v2295_v5 }
0x1ddc   :  { %v935_v24 = vpop.xlane.xlu0 %934  ;;  %v1172_v15 = vadd.f32 %v1171_v49, %v3110_v11 }
0x1ddd   :  { %2298 = vlog2.f32 %v935_v24 }
0x1ddf   :  { %716 = vrot.lane.b32.xlu1 %v2686_v63, %s2338_s5 }
0x1de0   :  { %v1400_v14 = vpop.xlane.xlu0 %1399 }
0x1de1   :  { %2300 = vlog2.f32 %v1400_v14 }
0x1de3   :  { %v2297_v6 = vpop.eup %2296 }
0x1de4   :  { %v489_v2 = vmul.f32 0.6931472, %v2297_v6  ;;  %v709_v10 = vpop.xlane.xlu0 %708 }
0x1de5   :  { %v710_v55 = vsub.f32 %v709_v10, %v704_v60 }
0x1de6   :  { %v490_v22 = vadd.f32 %v489_v2, %v3117_v39 }
0x1de7   :  { %v2299_v45 = vpop.eup %2298  ;;  %v713_v58 = vmul.f32 %v2740_v32, %v710_v55  ;;  %v721_v4 = vmul.f32 %v710_v55, %v2686_v63  ;;  %v1196_v63 = vmul.f32 %v2914_v56, %v2914_v56 }
0x1de8   :  { %v496_v37 = vsub.f32 %v495_v50, %v490_v22  ;;  %v937_v3 = vmul.f32 0.6931472, %v2299_v45  ;;  %v1177_v1 = vpop.xlane.xlu0 %1176 }
0x1de9   :  { %v1178_v19 = vsub.f32 %v1177_v1, %v1172_v15 }
0x1dea   :  { %v938_v29 = vadd.f32 %v937_v3, %v3122_v54  ;;  %v498_v18 = vmul.f32 %v2730_v21, %v496_v37  ;;  %v506_v34 = vmul.f32 %v496_v37, %v2619_v52  ;;  %v962_v52 = vmul.f32 %v2815_v23, %v2815_v23 }
0x1deb   :  { %v1181_v38 = vmul.f32 %v2856_v12, %v1178_v19  ;;  %v1189_v47 = vmul.f32 %v1178_v19, %v2914_v56 }
0x1dec   :  { %v944_v25 = vsub.f32 %v943_v30, %v938_v29  ;;  %v714_v39 = vadd.f32 %v713_v58, %v498_v18  ;;  %508 = vrot.lane.b32.xlu1 %v506_v34, %s2338_s5  ;;  %v502_v41 = vpop.permute.xlu0 %501 }
0x1dee   :  { %v947_v11 = vmul.f32 %v2751_v51, %v944_v25  ;;  %v955_v40 = vmul.f32 %v944_v25, %v2815_v23  ;;  %v1848_v25 = vmul.f32 2.0, %v3176_v8 }
0x1df0   :  { %v948_v43 = vadd.f32 %v947_v11, %v714_v39  ;;  %723 = vrot.lane.b32.xlu1 %v721_v4, %s2338_s5  ;;  %957 = vrot.lane.b32.xlu0 %v955_v40, %s2338_s5  ;;  %v516_v42 = vpop.permute.xlu0 %515 }
0x1df1   :  { %v518_v50 = vmul.f32 %v516_v42, %v2730_v21 }
0x1df2   :  { %v1182_v54 = vadd.f32 %v1181_v38, %v948_v43 }
0x1df4   :  { %950 = vrot.lane.b32.xlu1 %v2815_v23, %s2338_s5  ;;  %1184 = vrot.lane.b32.xlu0 %v2914_v56, %s2338_s5  ;;  %v2301_v23 = vpop.eup %2300  ;;  %v731_v13 = vpop.permute.xlu0 %730 }
0x1df5   :  { %v1402_v16 = vmul.f32 0.6931472, %v2301_v23  ;;  %v733_v49 = vmul.f32 %v731_v13, %v2740_v32 }
0x1df7   :  { %v1403_v44 = vadd.f32 %v1402_v16, %v3130_v9  ;;  %v734_v15 = vadd.f32 %v733_v49, %v518_v50 }
0x1df8   :  { %964 = vrot.lane.b32.xlu1 %v962_v52, %s2338_s5  ;;  %1198 = vrot.lane.b32.xlu0 %v1196_v63, %s2338_s5 }
0x1dfc   :  { %1191 = vrot.lane.b32.xlu1 %v1189_v47, %s2338_s5 }
0x1e00   :  { %1415 = vrot.lane.b32.xlu1 %v3043_v57, %s2338_s5 }
0x1e04   :  { %1429 = vrot.lane.b32.xlu1 %v1427_v17, %s2338_s5 }
0x1e5b   :  { %v1408_v7 = vpop.xlane.xlu1 %1407 }
0x1e5c   :  { %v1409_v46 = vsub.f32 %v1408_v7, %v1403_v44 }
0x1e5e   :  { %v1412_v56 = vmul.f32 %v2943_v33, %v1409_v46  ;;  %v1420_v61 = vmul.f32 %v1409_v46, %v3043_v57  ;;  %v504_v57 = vmul.f32 %v502_v41, %v2730_v21 }
0x1e5f   :  { %v717_v0 = vpop.permute.xlu1 %716 }
0x1e60   :  { %v1413_v27 = vadd.f32 %v1412_v56, %v1182_v54  ;;  %1422 = vrot.lane.b32.xlu0 %v1420_v61, %s2338_s5  ;;  %v719_v53 = vmul.f32 %v717_v0, %v2740_v32  ;;  %v1862_v54 = vmax.f32 %v3165_v36, 1e-07  ;;  %v1836_v0 = vmul.f32 8.0, %v3162_v62 }
0x1e62   :  { %v3225_v20 = vmul.f32 %v3176_v8, %v1413_v27  ;;  %v958_v35 = vpop.permute.xlu0 %957  ;;  %v720_v60 = vadd.f32 %v719_v53, %v504_v57  ;;  %v1863_v52 = vmin.f32 %v1862_v54, 0.9999999 }
0x1e63   :  { %v509_v48 = vpop.permute.xlu1 %508  ;;  %v960_v5 = vmul.f32 %v958_v35, %v2751_v51 }
0x1e64   :  { %v511_v9 = vmul.f32 %v509_v48, %v2730_v21 }
0x1e66   :  { %v1185_v28 = vpop.permute.xlu0 %1184 }
0x1e67   :  { %v724_v59 = vpop.permute.xlu1 %723  ;;  %v1187_v55 = vmul.f32 %v1185_v28, %v2856_v12 }
0x1e68   :  { %v726_v24 = vmul.f32 %v724_v59, %v2740_v32 }
0x1e6a   :  { %v727_v14 = vadd.f32 %v726_v24, %v511_v9  ;;  %v1199_v45 = vpop.permute.xlu0 %1198 }
0x1e6b   :  { %v951_v6 = vpop.permute.xlu1 %950  ;;  %v1201_v1 = vmul.f32 %v1199_v45, %v2856_v12 }
0x1e6c   :  { %v953_v2 = vmul.f32 %v951_v6, %v2751_v51  ;;  %v961_v10 = vadd.f32 %v960_v5, %v727_v14 }
0x1e6e   :  { %v954_v22 = vadd.f32 %v953_v2, %v720_v60 }
0x1e6f   :  { %v965_v58 = vpop.permute.xlu1 %964 }
0x1e70   :  { %v967_v37 = vmul.f32 %v965_v58, %v2751_v51  ;;  %v1188_v3 = vadd.f32 %v1187_v55, %v954_v22 }
0x1e72   :  { %v968_v19 = vadd.f32 %v967_v37, %v734_v15 }
0x1e73   :  { %v1192_v29 = vpop.permute.xlu1 %1191 }
0x1e74   :  { %v1194_v32 = vmul.f32 %v1192_v29, %v2856_v12  ;;  %v1202_v18 = vadd.f32 %v1201_v1, %v968_v19  ;;  %v1865_v12 = vsub.f32 1.0, %v1863_v52 }
0x1e76   :  { %v1195_v34 = vadd.f32 %v1194_v32, %v961_v10  ;;  %v1866_v63 = vsel %vm1864_vm5, %v1863_v52, %v1865_v12 }
0x1e77   :  { %v1416_v30 = vpop.permute.xlu1 %1415  ;;  %2302 = vlog2.f32 %v1866_v63  ;;  %v1870_v23 = vsub.f32 1.0, %v1866_v63 }
0x1e78   :  { %v1418_v21 = vmul.f32 %v1416_v30, %v2943_v33  ;;  %2304 = vrcp.f32 %v1836_v0 }
0x1e79   :  { %v1871_v41 = vmul.f32 %v1870_v23, %v1870_v23 }
0x1e7a   :  { %v1419_v38 = vadd.f32 %v1418_v21, %v1188_v3 }
0x1e7b   :  { %v1430_v39 = vpop.permute.xlu1 %1429 }
0x1e7c   :  { %v1849_v4 = vmul.f32 %v1848_v25, %v1419_v38  ;;  %v1432_v11 = vmul.f32 %v1430_v39, %v2943_v33 }
0x1e7e   :  { %v1433_v51 = vadd.f32 %v1432_v11, %v1202_v18 }
0x1e80   :  { %v1850_v40 = vsub.f32 %v1433_v51, %v1849_v4 }
0x1e81   :  { %v2303_v47 = vpop.eup %2302 }
0x1e82   :  { %v1853_v43 = vadd.f32 %v3181_v26, %v1850_v40  ;;  %v1868_v17 = vmul.f32 0.6931472, %v2303_v47  ;;  %v2305_v60 = vpop.eup %2304 }
0x1e84   :  { %v1869_v8 = vsub.f32 0.0, %v1868_v17  ;;  %v1854_v42 = vsel %vm527_vm12, %v1853_v43, 0.0 }
0x1e85   :  { %v1855_v7 = vrot.slane %v1854_v42, 4 }
0x1e86   :  { %v1872_v16 = vmul.f32 %v1871_v41, %v1869_v8 }
0x1e87   :  { %v1856_v56 = vadd.f32 %v1855_v7, %v1854_v42 }
0x1e88   :  { %v1873_v44 = vsel %vm527_vm12, %v1872_v16, 0.0 }
0x1e89   :  { %v1874_v46 = vrot.slane %v1873_v44, 4  ;;  %v1857_v27 = vrot.slane %v1856_v56, 2 }
0x1e8b   :  { %v1875_v31 = vadd.f32 %v1874_v46, %v1873_v44  ;;  %v1858_v9 = vadd.f32 %v1857_v27, %v1856_v56 }
0x1e8d   :  { %v1876_v59 = vrot.slane %v1875_v31, 2  ;;  %v1859_v5 = vrot.slane %v1858_v9, 1 }
0x1e8f   :  { %v1877_v28 = vadd.f32 %v1876_v59, %v1875_v31  ;;  %v1860_v49 = vadd.f32 %v1859_v5, %v1858_v9 }
0x1e91   :  { %v1878_v14 = vrot.slane %v1877_v28, 1  ;;  %v1861_v62 = vmul.f32 %v2305_v60, %v1860_v49 }
0x1e93   :  { %v1879_v2 = vadd.f32 %v1878_v14, %v1877_v28 }
0x1ed2   :  { %v1423_v26 = vpop.permute.xlu0 %1422 }
0x1ed3   :  { %v1425_v36 = vmul.f32 %v1423_v26, %v2943_v33 }
0x1ed5   :  { %v1426_v61 = vadd.f32 %v1425_v36, %v1195_v34 }
0x1ed7   :  { %v1838_v13 = vsub.f32 %v3225_v20, %v1426_v61 }
0x1ed9   :  { %v1839_v35 = vsel %vm527_vm12, %v1838_v13, 0.0  ;;  %vm1882_vm12 = vcmask 0  }
0x1eda   :  { %v1840_v48 = vrot.slane %v1839_v35, 4 }
0x1edc   :  { %v1841_v53 = vadd.f32 %v1840_v48, %v1839_v35 }
0x1ede   :  { %v1842_v24 = vrot.slane %v1841_v53, 2 }
0x1ee0   :  { %v1843_v57 = vadd.f32 %v1842_v24, %v1841_v53 }
0x1ee2   :  { %v1844_v33 = vrot.slane %v1843_v57, 1 }
0x1ee4   :  { %v1845_v6 = vadd.f32 %v1844_v33, %v1843_v57 }
0x1ee6   :  { %v1847_v20 = vmul.f32 %v2305_v60, %v1845_v6 }
0x1ee8   :  { %v1880_v10 = vsub.f32 %v1879_v2, %v1847_v20 }
0x1eea   :  { %v1881_v50 = vadd.f32 %v1880_v10, %v1861_v62 }
0x1eec   :  { %1883 = vst.msk [vmem:[#allocation3] sm:$0x1] %vm1882_vm12, %v1881_v50 }
0x1eed   :  { %2319 = shalt.err (!%p2316_p4)
}
0x1eee   :  { %s2320_s7 = scalar_lea.hbm %s3277_s14, 16 }
0x1eef   :  { %p2321_p5 = scmp.ne.s32.totalorder %s3277_s14, %s2320_s7  ;;  %p2324_p6 = scmp.lt.u32.totalorder %s2320_s7, %s3277_s14 }
0x1ef1   :  { %p2326_p7 = pnand %p2324_p6, %p2321_p5 }
0x1ef3   :  { %2329 = shalt.err (!%p2326_p7)
}
0x1ef4   :  { %1893 = dma.vmem_to_hbm [thread:$0]  %s1891_s15, 16, %s3277_s14, [#allocation4]  }
0x1ef5   :  { %2330 = dma.done.wait [#allocation4], 16  }
0x1ef6   :  { %2331 = vsyncadd [#allocation4], 4294967280 }
0x1ef7   :  { %1897 = vsyncpa [#allocation4], 1 }

</bundles_post_ra>
